<compile_context>
chip_gen: v6e
topology: v6e:2x2x1
jax: 0.10.0
libtpu: 0.0.40
codegen_flags: <defaults>
</compile_context>

<pallas_src>
import functools

import jax
import jax.numpy as jnp
from jax.experimental import pallas as pl
from jax.experimental.pallas import tpu as pltpu

_LANE = 128     # lane width  (last-dim granularity)
_SUBLANE = 8    # sublane width (second-to-last-dim granularity)


def _round_up(n, m):
    return ((n + m - 1) // m) * m


def _softplus(x):
    # Matches torch.nn.Softplus(beta=1, threshold=20):
    # softplus(x) = log1p(exp(x)), but returns x when x > 20.
    safe = jnp.minimum(x, 20.0)
    return jnp.where(x > 20.0, x, jnp.log1p(jnp.exp(safe)))


def _fnn_kernel(*refs, n_layers):
    """Fused MLP.  refs = (x_ref, w1, b1, ..., wL, bL, o_ref).

    One batch tile per grid point; all bf16 weights / f32 biases are
    full-array VMEM-resident blocks (constant index_map).  The running
    activation is cast to bf16 just before each MXU matmul; accumulation,
    bias add and softplus stay f32.  Intermediates never touch HBM.
    """
    x_ref, o_ref = refs[0], refs[-1]
    wb = refs[1:-1]

    h = x_ref[...]                                    # f32 (tile_b, d_in)
    for i in range(n_layers):
        w = wb[2 * i][...]                            # bf16 (K, N)
        b = wb[2 * i + 1][...]                        # f32  (1, N) row bcast
        y = jnp.dot(h.astype(jnp.bfloat16), w,
                    preferred_element_type=jnp.float32) + b
        # TODO(synk): post-bf16 the EUP (exp/log1p) is the ceiling on
        # v6e/v7x; a bf16 transcendental path would help there but is lossy
        # on v5e, so softplus is kept in f32 for all generations.
        h = _softplus(y) if i < n_layers - 1 else y
    o_ref[...] = h.astype(o_ref.dtype)


def init_fnn_params(key, d_in=332, d_out=1, n=300, hn=5):
    """Deterministic init matching torch.nn.Linear default U[-1/sqrt(fan_in), +]."""
    dims = [(d_in, n)] + [(n, n)] * (hn - 2) + [(n, d_out)]
    params = []
    for (fan_in, fan_out) in dims:
        key, kw, kb = jax.random.split(key, 3)
        bound = 1.0 / jnp.sqrt(jnp.float32(fan_in))
        # stored as (in, out) == transpose of torch's (out, in) weight
        w = jax.random.uniform(kw, (fan_in, fan_out), jnp.float32, -bound, bound)
        b = jax.random.uniform(kb, (fan_out,), jnp.float32, -bound, bound)
        params.append((w, b))
    return params


def pad_fnn_params(params):
    """Pad weights for the kernel and cast them to bf16.

    * Columns (out_features) are zero-padded to a lane multiple (128) for
      every layer; matching bias entries are zero.
    * Rows (in_features) are zero-padded to a lane multiple for every layer
      EXCEPT the first, whose K stays at the true d_in so x needs no
      feature-dim padding in the wrapper.  Zero rows guarantee that padded
      activations (softplus(0)=log 2) contribute nothing downstream.
    * Weights become bf16 (MXU operands); biases stay f32.
    """
    padded = []
    for li, (w, b) in enumerate(params):
        fi, fo = w.shape
        fi_p = fi if li == 0 else _round_up(fi, _LANE)
        fo_p = _round_up(fo, _LANE)
        w_p = jnp.zeros((fi_p, fo_p), jnp.float32).at[:fi, :fo].set(w)
        b_p = jnp.zeros((1, fo_p), jnp.float32).at[0, :fo].set(b)
        padded.append((w_p.astype(jnp.bfloat16), b_p))
    return padded


def fnn_forward(params, x, *, max_tile_b=512):
    """Run the fused MLP.  x: (B, d_in) f32.  Returns (B, d_out) f32."""
    B, d_in = x.shape
    n_layers = len(params)
    d_out = params[-1][0].shape[1]

    padded = pad_fnn_params(params)
    assert padded[0][0].shape[0] == d_in
    d_out_p = padded[-1][0].shape[1]

    # ---- batch tiling ----------------------------------------------------
    # Keep >= 2 tiles when the batch allows it (v7x splits the "parallel"
    # axis across its two TensorCores), snap big tiles to multiples of 256
    # (MXU M-streaming on v6e/v7x), always a multiple of the sublane width.
    if B > 2 * _SUBLANE:
        cap = _round_up(-(-B // 2), _SUBLANE)          # ceil(B/2) -> mult of 8
    else:
        cap = _round_up(B, _SUBLANE)
    tile_b = min(max_tile_b, cap)
    if tile_b >= 256:
        tile_b -= tile_b % 256
    tile_b = max(_round_up(tile_b, _SUBLANE), _SUBLANE)
    b_pad = _round_up(B, tile_b)

    # Only batch-dim padding (cheap); feature dim stays at the true d_in so
    # there is no wrapper-side read+rewrite of the whole input in HBM.
    x_p = x if b_pad == B else jnp.zeros((b_pad, d_in), x.dtype).at[:B].set(x)

    flat_params = []
    in_specs = [pl.BlockSpec((tile_b, d_in), lambda i: (i, 0))]
    for w_p, b_p in padded:
        flat_params += [w_p, b_p]
        # Full-array blocks + constant index_map -> weights/biases stay
        # VMEM-resident across all batch tiles (fetched once, not per step).
        in_specs.append(pl.BlockSpec(w_p.shape, lambda i: (0, 0)))
        in_specs.append(pl.BlockSpec(b_p.shape, lambda i: (0, 0)))

    # Advisory cost estimate so XLA schedules around the custom call.
    flops = 2 * b_pad * sum(int(w.shape[0]) * int(w.shape[1]) for w, _ in padded)
    transcendentals = 2 * b_pad * sum(int(w.shape[1]) for w, _ in padded[:-1])
    bytes_accessed = (
        x_p.size * x_p.dtype.itemsize
        + b_pad * d_out_p * 4
        + sum(w.size * w.dtype.itemsize + b.size * b.dtype.itemsize
              for w, b in padded))

    kernel = functools.partial(_fnn_kernel, n_layers=n_layers)
    out_p = pl.pallas_call(
        kernel,
        out_shape=jax.ShapeDtypeStruct((b_pad, d_out_p), jnp.float32),
        grid=(b_pad // tile_b,),
        in_specs=in_specs,
        out_specs=pl.BlockSpec((tile_b, d_out_p), lambda i: (i, 0)),
        compiler_params=pltpu.CompilerParams(
            dimension_semantics=("parallel",),
            vmem_limit_bytes=32 * 1024 * 1024,
        ),
        cost_estimate=pl.CostEstimate(
            flops=flops,
            transcendentals=transcendentals,
            bytes_accessed=bytes_accessed),
    )(x_p, *flat_params)

    return out_p[:B, :d_out]


if __name__ == "__main__":
    key = jax.random.PRNGKey(0)
    k_params, k_x = jax.random.split(key)

    d_in, d_out, n, hn = 332, 1, 300, 5
    batch = 8  # small demo batch; the wrapper tiles/pads any batch size

    params = init_fnn_params(k_params, d_in=d_in, d_out=d_out, n=n, hn=hn)
    x = jax.random.normal(k_x, (batch, d_in), jnp.float32)

    out = fnn_forward(params, x)
    out = jax.block_until_ready(out)
    assert out.shape == (batch, d_out), out.shape

    # Reference 1: same math as the kernel (bf16 matmul operands, f32 acc,
    # f32 bias/softplus) -> tight agreement expected.
    h = x
    for i, (w, b) in enumerate(params):
        h = jnp.dot(h.astype(jnp.bfloat16), w.astype(jnp.bfloat16),
                    preferred_element_type=jnp.float32) + b
        if i < len(params) - 1:
            h = jnp.where(h > 20.0, h,
                          jnp.log1p(jnp.exp(jnp.minimum(h, 20.0))))
    assert jnp.allclose(out, h, atol=2e-3, rtol=2e-3), (
        float(jnp.max(jnp.abs(out - h))))

    # Reference 2: full-f32 math -> loose tolerance covers bf16 operand
    # rounding accumulated over the 5 layers.
    r = x
    for i, (w, b) in enumerate(params):
        r = r @ w + b
        if i < len(params) - 1:
            r = jnp.where(r > 20.0, r,
                          jnp.log1p(jnp.exp(jnp.minimum(r, 20.0))))
    assert jnp.allclose(out, r, atol=1e-1, rtol=1e-1), (
        float(jnp.max(jnp.abs(out - r))))

    print("KERNEL_OK")
</pallas_src>

<mosaic_0001>
module attributes {stable_mosaic.version = 11 : i64} {
  func.func @_fnn_kernel(%arg0: i32, %arg1: memref<8x332xf32, #tpu.memory_space<vmem>>, %arg2: memref<332x384xbf16, #tpu.memory_space<vmem>>, %arg3: memref<1x384xf32, #tpu.memory_space<vmem>>, %arg4: memref<384x384xbf16, #tpu.memory_space<vmem>>, %arg5: memref<1x384xf32, #tpu.memory_space<vmem>>, %arg6: memref<384x384xbf16, #tpu.memory_space<vmem>>, %arg7: memref<1x384xf32, #tpu.memory_space<vmem>>, %arg8: memref<384x384xbf16, #tpu.memory_space<vmem>>, %arg9: memref<1x384xf32, #tpu.memory_space<vmem>>, %arg10: memref<384x128xbf16, #tpu.memory_space<vmem>>, %arg11: memref<1x128xf32, #tpu.memory_space<vmem>>, %arg12: memref<8x128xf32, #tpu.memory_space<vmem>>) attributes {dimension_semantics = [#tpu.dimension_semantics<parallel>], iteration_bounds = array<i64: 1>, scalar_prefetch = 0 : i64, scratch_operands = 0 : i64, tpu.core_type = #tpu.core_type<tc>, window_params = [{transform_indices = @transform_0, window_bounds = array<i64: 8, 332>}, {pipeline_mode = #tpu.pipeline_mode<synchronous>, transform_indices = @transform_1, window_bounds = array<i64: 332, 384>}, {pipeline_mode = #tpu.pipeline_mode<synchronous>, transform_indices = @transform_2, window_bounds = array<i64: 1, 384>}, {pipeline_mode = #tpu.pipeline_mode<synchronous>, transform_indices = @transform_3, window_bounds = array<i64: 384, 384>}, {pipeline_mode = #tpu.pipeline_mode<synchronous>, transform_indices = @transform_4, window_bounds = array<i64: 1, 384>}, {pipeline_mode = #tpu.pipeline_mode<synchronous>, transform_indices = @transform_5, window_bounds = array<i64: 384, 384>}, {pipeline_mode = #tpu.pipeline_mode<synchronous>, transform_indices = @transform_6, window_bounds = array<i64: 1, 384>}, {pipeline_mode = #tpu.pipeline_mode<synchronous>, transform_indices = @transform_7, window_bounds = array<i64: 384, 384>}, {pipeline_mode = #tpu.pipeline_mode<synchronous>, transform_indices = @transform_8, window_bounds = array<i64: 1, 384>}, {pipeline_mode = #tpu.pipeline_mode<synchronous>, transform_indices = @transform_9, window_bounds = array<i64: 384, 128>}, {pipeline_mode = #tpu.pipeline_mode<synchronous>, transform_indices = @transform_10, window_bounds = array<i64: 1, 128>}, {transform_indices = @transform_11, window_bounds = array<i64: 8, 128>}]} {
    %c0 = arith.constant 0 : index
    %c0_0 = arith.constant 0 : index
    %0 = vector.load %arg1[%c0, %c0_0] : memref<8x332xf32, #tpu.memory_space<vmem>>, vector<8x332xf32>
    %c0_1 = arith.constant 0 : index
    %c0_2 = arith.constant 0 : index
    %1 = vector.load %arg2[%c0_1, %c0_2] : memref<332x384xbf16, #tpu.memory_space<vmem>>, vector<332x384xbf16>
    %c0_3 = arith.constant 0 : index
    %c0_4 = arith.constant 0 : index
    %2 = vector.load %arg3[%c0_3, %c0_4] : memref<1x384xf32, #tpu.memory_space<vmem>>, vector<1x384xf32>
    %3 = arith.truncf %0 : vector<8x332xf32> to vector<8x332xbf16>
    %cst = arith.constant dense<0.000000e+00> : vector<8x384xf32>
    %4 = tpu.matmul %3, %1, %cst {dimension_numbers = #tpu.dot_dimension_numbers<[1], [0], [0], [1], [0, 0, 1, 1], [], []>} : vector<8x332xbf16>, vector<332x384xbf16>, vector<8x384xf32> -> vector<8x384xf32>
    %5 = vector.broadcast %2 : vector<1x384xf32> to vector<8x384xf32>
    %6 = arith.addf %4, %5 : vector<8x384xf32>
    %cst_5 = arith.constant 2.000000e+01 : f32
    %7 = vector.broadcast %cst_5 : f32 to vector<8x384xf32>
    %8 = arith.minimumf %6, %7 : vector<8x384xf32>
    %cst_6 = arith.constant 2.000000e+01 : f32
    %9 = vector.broadcast %cst_6 : f32 to vector<8x384xf32>
    %10 = arith.cmpf ogt, %6, %9 : vector<8x384xf32>
    %11 = math.exp %8 : vector<8x384xf32>
    %12 = math.log1p %11 : vector<8x384xf32>
    %13 = arith.select %10, %6, %12 : vector<8x384xi1>, vector<8x384xf32>
    %c0_7 = arith.constant 0 : index
    %c0_8 = arith.constant 0 : index
    %14 = vector.load %arg4[%c0_7, %c0_8] : memref<384x384xbf16, #tpu.memory_space<vmem>>, vector<384x384xbf16>
    %c0_9 = arith.constant 0 : index
    %c0_10 = arith.constant 0 : index
    %15 = vector.load %arg5[%c0_9, %c0_10] : memref<1x384xf32, #tpu.memory_space<vmem>>, vector<1x384xf32>
    %16 = arith.truncf %13 : vector<8x384xf32> to vector<8x384xbf16>
    %cst_11 = arith.constant dense<0.000000e+00> : vector<8x384xf32>
    %17 = tpu.matmul %16, %14, %cst_11 {dimension_numbers = #tpu.dot_dimension_numbers<[1], [0], [0], [1], [0, 0, 1, 1], [], []>} : vector<8x384xbf16>, vector<384x384xbf16>, vector<8x384xf32> -> vector<8x384xf32>
    %18 = vector.broadcast %15 : vector<1x384xf32> to vector<8x384xf32>
    %19 = arith.addf %17, %18 : vector<8x384xf32>
    %cst_12 = arith.constant 2.000000e+01 : f32
    %20 = vector.broadcast %cst_12 : f32 to vector<8x384xf32>
    %21 = arith.minimumf %19, %20 : vector<8x384xf32>
    %cst_13 = arith.constant 2.000000e+01 : f32
    %22 = vector.broadcast %cst_13 : f32 to vector<8x384xf32>
    %23 = arith.cmpf ogt, %19, %22 : vector<8x384xf32>
    %24 = math.exp %21 : vector<8x384xf32>
    %25 = math.log1p %24 : vector<8x384xf32>
    %26 = arith.select %23, %19, %25 : vector<8x384xi1>, vector<8x384xf32>
    %c0_14 = arith.constant 0 : index
    %c0_15 = arith.constant 0 : index
    %27 = vector.load %arg6[%c0_14, %c0_15] : memref<384x384xbf16, #tpu.memory_space<vmem>>, vector<384x384xbf16>
    %c0_16 = arith.constant 0 : index
    %c0_17 = arith.constant 0 : index
    %28 = vector.load %arg7[%c0_16, %c0_17] : memref<1x384xf32, #tpu.memory_space<vmem>>, vector<1x384xf32>
    %29 = arith.truncf %26 : vector<8x384xf32> to vector<8x384xbf16>
    %cst_18 = arith.constant dense<0.000000e+00> : vector<8x384xf32>
    %30 = tpu.matmul %29, %27, %cst_18 {dimension_numbers = #tpu.dot_dimension_numbers<[1], [0], [0], [1], [0, 0, 1, 1], [], []>} : vector<8x384xbf16>, vector<384x384xbf16>, vector<8x384xf32> -> vector<8x384xf32>
    %31 = vector.broadcast %28 : vector<1x384xf32> to vector<8x384xf32>
    %32 = arith.addf %30, %31 : vector<8x384xf32>
    %cst_19 = arith.constant 2.000000e+01 : f32
    %33 = vector.broadcast %cst_19 : f32 to vector<8x384xf32>
    %34 = arith.minimumf %32, %33 : vector<8x384xf32>
    %cst_20 = arith.constant 2.000000e+01 : f32
    %35 = vector.broadcast %cst_20 : f32 to vector<8x384xf32>
    %36 = arith.cmpf ogt, %32, %35 : vector<8x384xf32>
    %37 = math.exp %34 : vector<8x384xf32>
    %38 = math.log1p %37 : vector<8x384xf32>
    %39 = arith.select %36, %32, %38 : vector<8x384xi1>, vector<8x384xf32>
    %c0_21 = arith.constant 0 : index
    %c0_22 = arith.constant 0 : index
    %40 = vector.load %arg8[%c0_21, %c0_22] : memref<384x384xbf16, #tpu.memory_space<vmem>>, vector<384x384xbf16>
    %c0_23 = arith.constant 0 : index
    %c0_24 = arith.constant 0 : index
    %41 = vector.load %arg9[%c0_23, %c0_24] : memref<1x384xf32, #tpu.memory_space<vmem>>, vector<1x384xf32>
    %42 = arith.truncf %39 : vector<8x384xf32> to vector<8x384xbf16>
    %cst_25 = arith.constant dense<0.000000e+00> : vector<8x384xf32>
    %43 = tpu.matmul %42, %40, %cst_25 {dimension_numbers = #tpu.dot_dimension_numbers<[1], [0], [0], [1], [0, 0, 1, 1], [], []>} : vector<8x384xbf16>, vector<384x384xbf16>, vector<8x384xf32> -> vector<8x384xf32>
    %44 = vector.broadcast %41 : vector<1x384xf32> to vector<8x384xf32>
    %45 = arith.addf %43, %44 : vector<8x384xf32>
    %cst_26 = arith.constant 2.000000e+01 : f32
    %46 = vector.broadcast %cst_26 : f32 to vector<8x384xf32>
    %47 = arith.minimumf %45, %46 : vector<8x384xf32>
    %cst_27 = arith.constant 2.000000e+01 : f32
    %48 = vector.broadcast %cst_27 : f32 to vector<8x384xf32>
    %49 = arith.cmpf ogt, %45, %48 : vector<8x384xf32>
    %50 = math.exp %47 : vector<8x384xf32>
    %51 = math.log1p %50 : vector<8x384xf32>
    %52 = arith.select %49, %45, %51 : vector<8x384xi1>, vector<8x384xf32>
    %c0_28 = arith.constant 0 : index
    %c0_29 = arith.constant 0 : index
    %53 = vector.load %arg10[%c0_28, %c0_29] : memref<384x128xbf16, #tpu.memory_space<vmem>>, vector<384x128xbf16>
    %c0_30 = arith.constant 0 : index
    %c0_31 = arith.constant 0 : index
    %54 = vector.load %arg11[%c0_30, %c0_31] : memref<1x128xf32, #tpu.memory_space<vmem>>, vector<1x128xf32>
    %55 = arith.truncf %52 : vector<8x384xf32> to vector<8x384xbf16>
    %cst_32 = arith.constant dense<0.000000e+00> : vector<8x128xf32>
    %56 = tpu.matmul %55, %53, %cst_32 {dimension_numbers = #tpu.dot_dimension_numbers<[1], [0], [0], [1], [0, 0, 1, 1], [], []>} : vector<8x384xbf16>, vector<384x128xbf16>, vector<8x128xf32> -> vector<8x128xf32>
    %57 = vector.broadcast %54 : vector<1x128xf32> to vector<8x128xf32>
    %58 = arith.addf %56, %57 : vector<8x128xf32>
    %c0_33 = arith.constant 0 : index
    %c0_34 = arith.constant 0 : index
    %59 = vector.load %arg12[%c0_33, %c0_34] : memref<8x128xf32, #tpu.memory_space<vmem>>, vector<8x128xf32>
    tpu.vector_store %arg12[%c0_33, %c0_34], %58 {strides = array<i32>} : memref<8x128xf32, #tpu.memory_space<vmem>>, vector<8x128xf32>,
    return
  }
  func.func @transform_0(%arg0: i32) -> (i32, i32) {
    %c0_i32 = arith.constant 0 : i32
    %c0_i32_0 = arith.constant 0 : i32
    return %arg0, %c0_i32 : i32, i32
  }
  func.func @transform_1(%arg0: i32) -> (i32, i32) {
    %c0_i32 = arith.constant 0 : i32
    %c0_i32_0 = arith.constant 0 : i32
    %c0_i32_1 = arith.constant 0 : i32
    return %c0_i32, %c0_i32_0 : i32, i32
  }
  func.func @transform_2(%arg0: i32) -> (i32, i32) {
    %c0_i32 = arith.constant 0 : i32
    %c0_i32_0 = arith.constant 0 : i32
    %c0_i32_1 = arith.constant 0 : i32
    return %c0_i32, %c0_i32_0 : i32, i32
  }
  func.func @transform_3(%arg0: i32) -> (i32, i32) {
    %c0_i32 = arith.constant 0 : i32
    %c0_i32_0 = arith.constant 0 : i32
    %c0_i32_1 = arith.constant 0 : i32
    return %c0_i32, %c0_i32_0 : i32, i32
  }
  func.func @transform_4(%arg0: i32) -> (i32, i32) {
    %c0_i32 = arith.constant 0 : i32
    %c0_i32_0 = arith.constant 0 : i32
    %c0_i32_1 = arith.constant 0 : i32
    return %c0_i32, %c0_i32_0 : i32, i32
  }
  func.func @transform_5(%arg0: i32) -> (i32, i32) {
    %c0_i32 = arith.constant 0 : i32
    %c0_i32_0 = arith.constant 0 : i32
    %c0_i32_1 = arith.constant 0 : i32
    return %c0_i32, %c0_i32_0 : i32, i32
  }
  func.func @transform_6(%arg0: i32) -> (i32, i32) {
    %c0_i32 = arith.constant 0 : i32
    %c0_i32_0 = arith.constant 0 : i32
    %c0_i32_1 = arith.constant 0 : i32
    return %c0_i32, %c0_i32_0 : i32, i32
  }
  func.func @transform_7(%arg0: i32) -> (i32, i32) {
    %c0_i32 = arith.constant 0 : i32
    %c0_i32_0 = arith.constant 0 : i32
    %c0_i32_1 = arith.constant 0 : i32
    return %c0_i32, %c0_i32_0 : i32, i32
  }
  func.func @transform_8(%arg0: i32) -> (i32, i32) {
    %c0_i32 = arith.constant 0 : i32
    %c0_i32_0 = arith.constant 0 : i32
    %c0_i32_1 = arith.constant 0 : i32
    return %c0_i32, %c0_i32_0 : i32, i32
  }
  func.func @transform_9(%arg0: i32) -> (i32, i32) {
    %c0_i32 = arith.constant 0 : i32
    %c0_i32_0 = arith.constant 0 : i32
    %c0_i32_1 = arith.constant 0 : i32
    return %c0_i32, %c0_i32_0 : i32, i32
  }
  func.func @transform_10(%arg0: i32) -> (i32, i32) {
    %c0_i32 = arith.constant 0 : i32
    %c0_i32_0 = arith.constant 0 : i32
    %c0_i32_1 = arith.constant 0 : i32
    return %c0_i32, %c0_i32_0 : i32, i32
  }
  func.func @transform_11(%arg0: i32) -> (i32, i32) {
    %c0_i32 = arith.constant 0 : i32
    %c0_i32_0 = arith.constant 0 : i32
    return %arg0, %c0_i32 : i32, i32
  }
}

</mosaic_0001>

<bundles_post_ra>
// kernel: tpu_custom_call.1
= control target key start
LH: loop header
LB: loop body
LE: loop exit
PB: predicated region body
PF: predicated region fallthrough
CT: control target
= control target key end

     0   :  { %16 = vsyncpa [#allocation3], 0  ;;  %s4564_s0 = inlined_call_operand.hbm [shape: f32[8,332], index: 0, kind: input, shape index: {}]   ;;  %s4565_s1 = inlined_call_operand.hbm [shape: bf16[332,384], index: 1, kind: input, shape index: {}]   ;;  %s4566_s2 = inlined_call_operand.vmem [shape: f32[1,384], index: 2, kind: input, shape index: {}]   ;;  %s4567_s3 = inlined_call_operand.hbm [shape: bf16[384,384], index: 3, kind: input, shape index: {}]   ;;  %s4568_s4 = inlined_call_operand.vmem [shape: f32[1,384], index: 4, kind: input, shape index: {}]   ;;  %s4569_s5 = inlined_call_operand.hbm [shape: bf16[384,384], index: 5, kind: input, shape index: {}]   ;;  %s4570_s6 = inlined_call_operand.vmem [shape: f32[1,384], index: 6, kind: input, shape index: {}]   ;;  %s4571_s7 = inlined_call_operand.hbm [shape: bf16[384,384], index: 7, kind: input, shape index: {}]   ;;  %s4572_s8 = inlined_call_operand.vmem [shape: f32[1,384], index: 8, kind: input, shape index: {}]   ;;  %s4573_s9 = inlined_call_operand.hbm [shape: bf16[384,128], index: 9, kind: input, shape index: {}]   ;;  %s4574_s10 = inlined_call_operand.vmem [shape: f32[1,128], index: 10, kind: input, shape index: {}]   ;;  %s4575_s11 = inlined_call_operand.hbm [shape: f32[8,128], index: 11, kind: output, shape index: {}]  }
   0x1   :  { %17 = vsyncpa [#allocation6], 0 }
   0x2   :  { %18 = vsyncpa [#allocation9], 0 }
   0x3   :  { %19 = vsyncpa [#allocation12], 0 }
   0x4   :  { %20 = vsyncpa [#allocation4], 0  ;;  %s4352_s17 = smov [#allocation5]  }
   0x5   :  { %s36_s18 = sshll.u32 %s4352_s17, 4  ;;  %s37_s18 = int_to_ptr.vmem [resolvable:$true] %s36_s18 }
   0x6   :  { %s4210_s19 = scalar_lea.vmem %s37_s18, 8064  ;;  %p4215_p1 = scmp.lt.s32.totalorder %s37_s18, %s37_s18 }
   0x7   :  { %p4211_p0 = scmp.ne.s32.totalorder %s37_s18, %s4210_s19  ;;  %p4216_p2 = scmp.lt.s32.totalorder %s4210_s19, %s4210_s19 }
   0x9   :  { %p4217_p3 = por %p4216_p2, %p4215_p1 }
   0xb   :  { %p4218_p4 = pnand %p4217_p3, %p4211_p0 }
   0xd   :  { %4221 = shalt.err (!%p4218_p4)
}
   0xe   :  { %s4353_s20 = smov 192   ;;  %s4354_s21 = smov 12  }
   0xf   :  { %42 = dma.hbm_to_vmem [thread:$0]  %s4565_s1, 8064, %s37_s18, [#allocation6], %s4353_s20, %s4353_s20, %s4354_s21  }
  0x10   :  { %s4355_s24 = smov [#allocation8]   ;;  %s4356_s26 = smov [#allocation2]  }
  0x11   :  { %s64_s25 = sshll.u32 %s4355_s24, 4  ;;  %s27_s27 = sshll.u32 %s4356_s26, 4  ;;  %s65_s25 = int_to_ptr.vmem [resolvable:$true] %s64_s25  ;;  %s28_s27 = int_to_ptr.vmem [resolvable:$true] %s27_s27 }
  0x12   :  { %s4230_s28 = scalar_lea.vmem %s65_s25, 9216  ;;  %p4235_p6 = scmp.lt.s32.totalorder %s65_s25, %s65_s25 }
  0x13   :  { %p4231_p5 = scmp.ne.s32.totalorder %s65_s25, %s4230_s28  ;;  %p4236_p7 = scmp.lt.s32.totalorder %s4230_s28, %s4230_s28 }
  0x15   :  { %p4237_p8 = por %p4236_p7, %p4235_p6 }
  0x17   :  { %p4238_p9 = pnand %p4237_p8, %p4231_p5 }
  0x19   :  { %4241 = shalt.err (!%p4238_p9)
}
  0x1a   :  { %70 = dma.hbm_to_vmem [thread:$0]  %s4569_s5, 9216, %s65_s25, [#allocation9], %s4353_s20, %s4353_s20, %s4354_s21  }
  0x1b   :  { %s4250_s1 = scalar_lea.vmem %s28_s27, 384  ;;  %p4255_p11 = scmp.lt.s32.totalorder %s28_s27, %s28_s27 }
  0x1c   :  { %p4251_p10 = scmp.ne.s32.totalorder %s28_s27, %s4250_s1  ;;  %p4256_p12 = scmp.lt.s32.totalorder %s4250_s1, %s4250_s1 }
  0x1e   :  { %p4257_p13 = por %p4256_p12, %p4255_p11 }
  0x20   :  { %p4258_p0 = pnand %p4257_p13, %p4251_p10 }
  0x22   :  { %4261 = shalt.err (!%p4258_p0)
}
  0x23   :  { %30 = dma.hbm_to_vmem [thread:$0]  %s4564_s0, 384, %s28_s27, [#allocation3]  }
  0x24   :  { %s4357_s14 = smov [#allocation7]   ;;  %s4358_s16 = smov [#allocation10]  }
  0x25   :  { %s50_s15 = sshll.u32 %s4357_s14, 4  ;;  %s78_s17 = sshll.u32 %s4358_s16, 4  ;;  %s51_s15 = int_to_ptr.vmem [resolvable:$true] %s50_s15  ;;  %s79_s17 = int_to_ptr.vmem [resolvable:$true] %s78_s17 }
  0x26   :  { %s4270_s18 = scalar_lea.vmem %s51_s15, 9216  ;;  %p4275_p2 = scmp.lt.s32.totalorder %s51_s15, %s51_s15 }
  0x27   :  { %p4271_p1 = scmp.ne.s32.totalorder %s51_s15, %s4270_s18  ;;  %p4276_p3 = scmp.lt.s32.totalorder %s4270_s18, %s4270_s18 }
  0x29   :  { %p4277_p4 = por %p4276_p3, %p4275_p2 }
  0x2b   :  { %p4278_p5 = pnand %p4277_p4, %p4271_p1 }
  0x2d   :  { %4281 = shalt.err (!%p4278_p5)
}
  0x2e   :  { %56 = dma.hbm_to_vmem [thread:$0]  %s4567_s3, 9216, %s51_s15, [#allocation6], %s4353_s20, %s4353_s20, %s4354_s21  }
  0x2f   :  { %s4290_s0 = scalar_lea.vmem %s79_s17, 9216  ;;  %p4295_p7 = scmp.lt.s32.totalorder %s79_s17, %s79_s17 }
  0x30   :  { %p4291_p6 = scmp.ne.s32.totalorder %s79_s17, %s4290_s0  ;;  %p4296_p8 = scmp.lt.s32.totalorder %s4290_s0, %s4290_s0 }
  0x32   :  { %p4297_p9 = por %p4296_p8, %p4295_p7 }
  0x34   :  { %p4298_p10 = pnand %p4297_p9, %p4291_p6 }
  0x36   :  { %4301 = shalt.err (!%p4298_p10)
}
  0x37   :  { %84 = dma.hbm_to_vmem [thread:$0]  %s4571_s7, 9216, %s79_s17, [#allocation9], %s4353_s20, %s4353_s20, %s4354_s21  }
  0x38   :  { %s4359_s24 = smov [#allocation11]  }
  0x39   :  { %s92_s25 = sshll.u32 %s4359_s24, 4  ;;  %s93_s25 = int_to_ptr.vmem [resolvable:$true] %s92_s25 }
  0x3a   :  { %s4310_s26 = scalar_lea.vmem %s93_s25, 3072  ;;  %p4315_p12 = scmp.lt.s32.totalorder %s93_s25, %s93_s25 }
  0x3b   :  { %p4311_p11 = scmp.ne.s32.totalorder %s93_s25, %s4310_s26  ;;  %p4316_p13 = scmp.lt.s32.totalorder %s4310_s26, %s4310_s26 }
  0x3d   :  { %p4317_p0 = por %p4316_p13, %p4315_p12 }
  0x3f   :  { %p4318_p1 = pnand %p4317_p0, %p4311_p11 }
  0x41   :  { %4321 = shalt.err (!%p4318_p1)
}
  0x42   :  { %s4360_s3 = smov 64   ;;  %s4361_s27 = smov 4  }
  0x43   :  { %98 = dma.hbm_to_vmem [thread:$0]  %s4573_s9, 3072, %s93_s25, [#allocation12], %s4360_s3, %s4360_s3, %s4361_s27  }
  0x44   :  { %4342 = dma.done.wait [#allocation3], 384  }
  0x45   :  { %4343 = vsyncadd [#allocation3], 4294966912 }
  0x46   :  { %4344 = dma.done.wait [#allocation6], 17280  }
  0x47   :  { %4345 = vsyncadd [#allocation6], 4294950016 }
  0x48   :  { %4346 = dma.done.wait [#allocation9], 18432  }
  0x49   :  { %4347 = vsyncadd [#allocation9], 4294948864 }
  0x4a   :  { %4348 = dma.done.wait [#allocation12], 3072  }
  0x4b   :  { %4349 = vsyncadd [#allocation12], 4294964224  ;;  %v4362_v0 = vmov 0   ;;  %v3758_v1 = vld [vmem:[#allocation5 + $0xac] ss:$12 sps:$4 sm:$0xff]   ;;  %vm564_vm0 = vcmask 1045504  }
  0x4c   :  { %647 = vmatprep.mubr.bf16.mxu1 %v4362_v0  ;;  %v3760_v2 = vld [vmem:[#allocation5 + $0x1e4] ss:$12 sps:$4 sm:$0x3f]   ;;  %574 = vmatprep.subr.bf16.mxu0 %v3758_v1  ;;  %v3762_v3 = vld [vmem:[#allocation5 + $0xa8] ss:$12 sps:$4 sm:$0xff]   ;;  %v122_v23 = vld [vmem:[#allocation2 + $0x10] sm:$0xff] }
  0x4d   :  { %v3763_v4 = vld [vmem:[#allocation5 + $0x1e0] ss:$12 sps:$4 sm:$0x3f]   ;;  %3254 = vmatprep.subr.msk.bf16.mxu1 %vm564_vm0, %v3760_v2  ;;  %575 = vmatpush1.bf16.msra.mxu0 %v3762_v3  ;;  %v3768_v8 = vld [vmem:[#allocation5 + $0x90] ss:$12 sps:$4 sm:$0xff]   ;;  %v4459_v26 = vpack.c.bf16 %v122_v23, %v122_v23  ;;  %vm560_vm1 = vcmask 621568  }
  0x4e   :  { %v3764_v5 = vld [vmem:[#allocation5 + $0x94] ss:$12 sps:$4 sm:$0xff]   ;;  %v566_v6 = vsel %vm564_vm0, %v3763_v4, 0  ;;  %v3766_v7 = vld [vmem:[#allocation5 + $0x1cc] ss:$12 sps:$4 sm:$0xff]   ;;  %v4363_v1 = vmov 0.0  }
  0x4f   :  { %622 = vmatpush1.bf16.msra.mxu1 %v566_v6  ;;  %576 = vmatprep.subr.bf16.mxu0 %v3764_v5  ;;  %v3769_v9 = vld [vmem:[#allocation5 + $0x1c8] ss:$12 sps:$4 sm:$0xff]   ;;  %v3774_v12 = vld [vmem:[#allocation5 + $0x78] ss:$12 sps:$4 sm:$0xff]   ;;  %v3775_v13 = vld [vmem:[#allocation5 + $0x1b0] ss:$12 sps:$4 sm:$0xff]  }
  0x50   :  { %623 = vmatprep.subr.bf16.mxu1 %v3766_v7  ;;  %v3770_v10 = vld [vmem:[#allocation5 + $0x7c] ss:$12 sps:$4 sm:$0xff]   ;;  %v3772_v11 = vld [vmem:[#allocation5 + $0x1b4] ss:$12 sps:$4 sm:$0xff]   ;;  %v3776_v14 = vld [vmem:[#allocation5 + $0x64] ss:$12 sps:$4 sm:$0xff]  }
  0x51   :  { %577 = vmatpush1.bf16.msra.mxu0 %v3768_v8  ;;  %v3778_v15 = vld [vmem:[#allocation5 + $0x19c] ss:$12 sps:$4 sm:$0xff]   ;;  %v3780_v16 = vld [vmem:[#allocation5 + $0x60] ss:$12 sps:$4 sm:$0xff]   ;;  %v3781_v17 = vld [vmem:[#allocation5 + $0x198] ss:$12 sps:$4 sm:$0xff]  }
  0x52   :  { %578 = vmatprep.subr.bf16.mxu0 %v3770_v10  ;;  %v3782_v18 = vld [vmem:[#allocation5 + $0x4c] ss:$12 sps:$4 sm:$0xff]   ;;  %v3784_v19 = vld [vmem:[#allocation5 + $0x184] ss:$12 sps:$4 sm:$0xff]   ;;  %v3786_v20 = vld [vmem:[#allocation5 + $0x48] ss:$12 sps:$4 sm:$0xff]  }
  0x53   :  { %624 = vmatpush1.bf16.msra.mxu1 %v3769_v9  ;;  %v3787_v21 = vld [vmem:[#allocation5 + $0x180] ss:$12 sps:$4 sm:$0xff]   ;;  %v3790_v24 = vld [vmem:[#allocation5 + $0x170] ss:$12 sps:$4 sm:$0xff]   ;;  %v3795_v29 = vld [vmem:[#allocation5 + $0x158] ss:$12 sps:$4 sm:$0xff]  }
  0x54   :  { %625 = vmatprep.subr.bf16.mxu1 %v3772_v11  ;;  %v3788_v22 = vld [vmem:[#allocation5 + $0x34] ss:$12 sps:$4 sm:$0xff]   ;;  %v3791_v25 = vld [vmem:[#allocation5 + $0x30] ss:$12 sps:$4 sm:$0xff]   ;;  %v3796_v30 = vld [vmem:[#allocation5 + $0x18] ss:$12 sps:$4 sm:$0xff]  }
  0x55   :  { %579 = vmatpush1.bf16.msra.mxu0 %v3774_v12  ;;  %v3792_v27 = vld [vmem:[#allocation5 + $0xb0] ss:$12 sps:$4 sm:$0xff]   ;;  %v3797_v31 = vld [vmem:[#allocation5 + $0x98] ss:$12 sps:$4 sm:$0xff]   ;;  %v3800_v33 = vld [vmem:[#allocation5 + $0x140] ss:$12 sps:$4 sm:$0xff]  }
  0x56   :  { %580 = vmatprep.subr.bf16.mxu0 %v3776_v14  ;;  %v3793_v28 = vld [vmem:[#allocation5 + $0x1c] ss:$12 sps:$4 sm:$0xff]   ;;  %v3798_v32 = vld [vmem:[#allocation5 + $0x4] ss:$12 sps:$4 sm:$0xff]   ;;  %v3801_v34 = vld [vmem:[#allocation5] ss:$12 sps:$4 sm:$0xff]  }
  0x57   :  { %626 = vmatpush1.bf16.msra.mxu1 %v3775_v13  ;;  %v3802_v35 = vld [vmem:[#allocation5 + $0x80] ss:$12 sps:$4 sm:$0xff]   ;;  %v3805_v37 = vld [vmem:[#allocation5 + $0x128] ss:$12 sps:$4 sm:$0xff]   ;;  %v3810_v41 = vld [vmem:[#allocation5 + $0x110] ss:$12 sps:$4 sm:$0xff]  }
  0x58   :  { %627 = vmatprep.subr.bf16.mxu1 %v3778_v15  ;;  %v3803_v36 = vld [vmem:[#allocation5 + $0x16c] ss:$12 sps:$4 sm:$0xff]   ;;  %v3806_v38 = vld [vmem:[#allocation5 + $0x168] ss:$12 sps:$4 sm:$0xff]   ;;  %v3811_v42 = vld [vmem:[#allocation5 + $0x150] ss:$12 sps:$4 sm:$0xff]  }
  0x59   :  { %581 = vmatpush1.bf16.msra.mxu0 %v3780_v16  ;;  %v3807_v39 = vld [vmem:[#allocation5 + $0x68] ss:$12 sps:$4 sm:$0xff]   ;;  %v3812_v43 = vld [vmem:[#allocation5 + $0x50] ss:$12 sps:$4 sm:$0xff]   ;;  %v3815_v45 = vld [vmem:[#allocation5 + $0xf8] ss:$12 sps:$4 sm:$0xff]  }
  0x5a   :  { %582 = vmatprep.subr.bf16.mxu0 %v3782_v18  ;;  %v3808_v40 = vld [vmem:[#allocation5 + $0x154] ss:$12 sps:$4 sm:$0xff]   ;;  %v3813_v44 = vld [vmem:[#allocation5 + $0x13c] ss:$12 sps:$4 sm:$0xff]   ;;  %v3816_v46 = vld [vmem:[#allocation5 + $0x138] ss:$12 sps:$4 sm:$0xff]  }
  0x5b   :  { %628 = vmatpush1.bf16.msra.mxu1 %v3781_v17  ;;  %v121_v47 = vld [vmem:[#allocation2 + $0x8] sm:$0xff]  ;;  %v3817_v48 = vld [vmem:[#allocation5 + $0x38] ss:$12 sps:$4 sm:$0xff]   ;;  %v3820_v51 = vld [vmem:[#allocation5 + $0xe0] ss:$12 sps:$4 sm:$0xff]   ;;  %vm4364_vm2 = vmmov 0  }
  0x5c   :  { %629 = vmatprep.subr.bf16.mxu1 %v3784_v19  ;;  %v3818_v49 = vld [vmem:[#allocation5 + $0x124] ss:$12 sps:$4 sm:$0xff]   ;;  %v209_v50 = vpack.c.bf16 %v121_v47, %v121_v47  ;;  %v3821_v52 = vld [vmem:[#allocation5 + $0x120] ss:$12 sps:$4 sm:$0xff]   ;;  %v3825_v55 = vld [vmem:[#allocation5 + $0xc8] ss:$12 sps:$4 sm:$0xff]  }
  0x5d   :  { %583 = vmatpush1.bf16.msra.mxu0 %v3786_v20  ;;  %v3822_v53 = vld [vmem:[#allocation5 + $0x20] ss:$12 sps:$4 sm:$0xff]   ;;  %v3826_v56 = vld [vmem:[#allocation5 + $0x108] ss:$12 sps:$4 sm:$0xff]   ;;  %v3830_v61 = vld [vmem:[#allocation5 + $0xf0] ss:$12 sps:$4 sm:$0xff]  }
  0x5e   :  { %584 = vmatprep.subr.bf16.mxu0 %v3788_v22  ;;  %606 = vmatprep.mubr.bf16.mxu0 %v209_v50  ;;  %v3823_v54 = vld [vmem:[#allocation5 + $0x10c] ss:$12 sps:$4 sm:$0xff]   ;;  %v3827_v57 = vld [vmem:[#allocation5 + $0x8] ss:$12 sps:$4 sm:$0xff]   ;;  %v3835_v4 = vld [vmem:[#allocation5 + $0x1d0] ss:$12 sps:$4 sm:$0xff]  }
  0x5f   :  { %630 = vmatpush1.bf16.msra.mxu1 %v3787_v21  ;;  %v3828_v58 = vld [vmem:[#allocation5 + $0xf4] ss:$12 sps:$4 sm:$0xff]   ;;  %v120_v60 = vld [vmem:[#allocation2] sm:$0xff]  ;;  %v3834_v3 = vld [vmem:[#allocation5 + $0xd8] ss:$12 sps:$4 sm:$0xff]   ;;  %s4365_s12 = smov [#allocation13]  }
  0x60   :  { %3498 = vmatprep.subr.bf16.mxu1 %v3790_v24  ;;  %v3831_v59 = vld [vmem:[#allocation5 + $0x1e8] ss:$12 sps:$4 sm:$0x3f]   ;;  %v208_v63 = vpack.c.bf16 %v120_v60, %v120_v60  ;;  %v3836_v5 = vld [vmem:[#allocation5 + $0xc4] ss:$12 sps:$4 sm:$0xff]   ;;  %s3179_s13 = sshll.u32 %s4365_s12, 4  ;;  %s3180_s13 = int_to_ptr.vmem [resolvable:$true] %s3179_s13 }
  0x61   :  { %585 = vmatpush1.bf16.msra.mxu0 %v3791_v25  ;;  %v3832_v62 = vld [vmem:[#allocation5 + $0xdc] ss:$12 sps:$4 sm:$0xff]   ;;  %v572_v2 = vsel %vm564_vm0, %v3831_v59, 0  ;;  %v3838_v6 = vld [vmem:[#allocation5 + $0xc0] ss:$12 sps:$4 sm:$0xff]   ;;  %s4322_s14 = scalar_lea.vmem %s3180_s13, 128  ;;  %p4327_p3 = scmp.lt.s32.totalorder %s3180_s13, %s3180_s13 }
  0x62   :  { %3255 = vmatmul.mubr.msk.bf16.vlgmr.msra.gmra.mxu1 %vm560_vm1, %v4459_v26  ;;  %586 = vmatprep.subr.bf16.mxu0 %v3793_v28  ;;  %v3839_v7 = vld [vmem:[#allocation5 + $0x1b8] ss:$12 sps:$4 sm:$0xff]   ;;  %v3840_v8 = vld [vmem:[#allocation5 + $0x1a0] ss:$12 sps:$4 sm:$0xff]   ;;  %v3841_v9 = vld [vmem:[#allocation5 + $0x188] ss:$12 sps:$4 sm:$0xff]   ;;  %p4323_p2 = scmp.ne.s32.totalorder %s3180_s13, %s4322_s14  ;;  %p4328_p4 = scmp.lt.s32.totalorder %s4322_s14, %s4322_s14 }
  0x63   :  { %3499 = vmatpush3.bf16.msra.mxu1 %v3792_v27  ;;  %688 = vmatprep.mubr.bf16.mxu1 %v209_v50  ;;  %v3842_v10 = vld [vmem:[#allocation7 + $0xa8] ss:$12 sps:$4 sm:$0xff]   ;;  %v3844_v11 = vld [vmem:[#allocation7 + $0xac] ss:$12 sps:$4 sm:$0xff]   ;;  %v3845_v12 = vld [vmem:[#allocation7 + $0x90] ss:$12 sps:$4 sm:$0xff]  }
  0x64   :  { %3500 = vmatprep.subr.bf16.mxu1 %v3795_v29  ;;  %v3847_v13 = vld [vmem:[#allocation7 + $0x94] ss:$12 sps:$4 sm:$0xff]   ;;  %v3850_v14 = vld [vmem:[#allocation7 + $0x7c] ss:$12 sps:$4 sm:$0xff]   ;;  %v3848_v15 = vld [vmem:[#allocation7 + $0x78] ss:$12 sps:$4 sm:$0xff]   ;;  %p4329_p5 = por %p4328_p4, %p4327_p3 }
  0x65   :  { %587 = vmatpush1.bf16.msra.mxu0 %v3796_v30  ;;  %v3853_v16 = vld [vmem:[#allocation7 + $0x64] ss:$12 sps:$4 sm:$0xff]   ;;  %v3851_v17 = vld [vmem:[#allocation7 + $0x60] ss:$12 sps:$4 sm:$0xff]   ;;  %v3854_v18 = vld [vmem:[#allocation7 + $0x48] ss:$12 sps:$4 sm:$0xff]  }
  0x66   :  { %588 = vmatprep.subr.bf16.mxu0 %v3798_v32  ;;  %v3856_v19 = vld [vmem:[#allocation7 + $0x4c] ss:$12 sps:$4 sm:$0xff]   ;;  %v3859_v20 = vld [vmem:[#allocation7 + $0x34] ss:$12 sps:$4 sm:$0xff]   ;;  %v3857_v21 = vld [vmem:[#allocation7 + $0x30] ss:$12 sps:$4 sm:$0xff]   ;;  %p4330_p6 = pnand %p4329_p5, %p4323_p2 }
  0x67   :  { %3501 = vmatpush3.bf16.msra.mxu1 %v3797_v31  ;;  %v3862_v22 = vld [vmem:[#allocation7 + $0x1c] ss:$12 sps:$4 sm:$0xff]   ;;  %v3860_v23 = vld [vmem:[#allocation7 + $0x18] ss:$12 sps:$4 sm:$0xff]   ;;  %v3863_v25 = vld [vmem:[#allocation7] ss:$12 sps:$4 sm:$0xff]  }
  0x68   :  { %3502 = vmatprep.subr.bf16.mxu1 %v3800_v33  ;;  %v3865_v24 = vld [vmem:[#allocation7 + $0x4] ss:$12 sps:$4 sm:$0xff]   ;;  %v3866_v27 = vld [vmem:[#allocation7 + $0x168] ss:$12 sps:$4 sm:$0xff]   ;;  %v3871_v28 = vld [vmem:[#allocation7 + $0x22c] ss:$12 sps:$4 sm:$0xff]  }
  0x69   :  { %589 = vmatpush1.bf16.msra.mxu0 %v3801_v34  ;;  %v3869_v29 = vld [vmem:[#allocation7 + $0x228] ss:$12 sps:$4 sm:$0xff]   ;;  %v3872_v31 = vld [vmem:[#allocation7 + $0x150] ss:$12 sps:$4 sm:$0xff]  }
  0x6a   :  { %590 = vmatprep.subr.bf16.mxu0 %v3803_v36  ;;  %v3874_v30 = vld [vmem:[#allocation7 + $0x154] ss:$12 sps:$4 sm:$0xff]   ;;  %v3875_v33 = vld [vmem:[#allocation7 + $0x210] ss:$12 sps:$4 sm:$0xff]  }
  0x6b   :  { %3503 = vmatpush3.bf16.msra.mxu1 %v3802_v35  ;;  %v3877_v32 = vld [vmem:[#allocation7 + $0x214] ss:$12 sps:$4 sm:$0xff]   ;;  %v3880_v34 = vld [vmem:[#allocation7 + $0x13c] ss:$12 sps:$4 sm:$0xff]   ;;  %v3878_v35 = vld [vmem:[#allocation7 + $0x138] ss:$12 sps:$4 sm:$0xff]  }
  0x6c   :  { %3504 = vmatprep.subr.bf16.mxu1 %v3805_v37  ;;  %v3883_v36 = vld [vmem:[#allocation7 + $0x1fc] ss:$12 sps:$4 sm:$0xff]   ;;  %v3881_v37 = vld [vmem:[#allocation7 + $0x1f8] ss:$12 sps:$4 sm:$0xff]  }
  0x6d   :  { %591 = vmatpush2.bf16.msra.mxu0 %v3806_v38  ;;  %v3886_v38 = vld [vmem:[#allocation7 + $0x124] ss:$12 sps:$4 sm:$0xff]   ;;  %v3904_v50 = vld [vmem:[#allocation7 + $0xdc] ss:$12 sps:$4 sm:$0xff]  }
  0x6e   :  { %592 = vmatprep.subr.bf16.mxu0 %v3808_v40  ;;  %v3889_v40 = vld [vmem:[#allocation7 + $0x1e4] ss:$12 sps:$4 sm:$0xff]  }
  0x6f   :  { %3505 = vmatpush3.bf16.msra.mxu1 %v3807_v39  ;;  %v3884_v39 = vld [vmem:[#allocation7 + $0x120] ss:$12 sps:$4 sm:$0xff]   ;;  %v3896_v47 = vld [vmem:[#allocation7 + $0xf0] ss:$12 sps:$4 sm:$0xff]  }
  0x70   :  { %3506 = vmatprep.subr.bf16.mxu1 %v3810_v41  ;;  %v3887_v41 = vld [vmem:[#allocation7 + $0x1e0] ss:$12 sps:$4 sm:$0xff]  }
  0x71   :  { %593 = vmatpush2.bf16.msra.mxu0 %v3811_v42  ;;  %v3892_v42 = vld [vmem:[#allocation7 + $0x10c] ss:$12 sps:$4 sm:$0xff]  }
  0x72   :  { %594 = vmatprep.subr.bf16.mxu0 %v3813_v44  ;;  %v3895_v44 = vld [vmem:[#allocation7 + $0x1cc] ss:$12 sps:$4 sm:$0xff]  }
  0x73   :  { %3507 = vmatpush3.bf16.msra.mxu1 %v3812_v43  ;;  %v3890_v43 = vld [vmem:[#allocation7 + $0x108] ss:$12 sps:$4 sm:$0xff]  }
  0x74   :  { %3508 = vmatprep.subr.bf16.mxu1 %v3815_v45  ;;  %v3893_v45 = vld [vmem:[#allocation7 + $0x1c8] ss:$12 sps:$4 sm:$0xff]  }
  0x75   :  { %595 = vmatpush2.bf16.msra.mxu0 %v3816_v46  ;;  %v3898_v46 = vld [vmem:[#allocation7 + $0xf4] ss:$12 sps:$4 sm:$0xff]  }
  0x76   :  { %596 = vmatprep.subr.bf16.mxu0 %v3818_v49  ;;  %v3899_v49 = vld [vmem:[#allocation7 + $0x1b0] ss:$12 sps:$4 sm:$0xff]  }
  0x77   :  { %3509 = vmatpush3.bf16.msra.mxu1 %v3817_v48  ;;  %v3901_v48 = vld [vmem:[#allocation7 + $0x1b4] ss:$12 sps:$4 sm:$0xff]  }
  0x78   :  { %3510 = vmatprep.subr.bf16.mxu1 %v3820_v51  ;;  %v3902_v51 = vld [vmem:[#allocation7 + $0xd8] ss:$12 sps:$4 sm:$0xff]  }
  0x79   :  { %597 = vmatpush2.bf16.msra.mxu0 %v3821_v52  ;;  %v3907_v52 = vld [vmem:[#allocation7 + $0x19c] ss:$12 sps:$4 sm:$0xff]  }
  0x7a   :  { %598 = vmatprep.subr.bf16.mxu0 %v3823_v54  ;;  %v3910_v54 = vld [vmem:[#allocation7 + $0xc4] ss:$12 sps:$4 sm:$0xff]  }
  0x7b   :  { %3511 = vmatpush3.bf16.msra.mxu1 %v3822_v53  ;;  %v3905_v53 = vld [vmem:[#allocation7 + $0x198] ss:$12 sps:$4 sm:$0xff]  }
  0x7c   :  { %3512 = vmatprep.subr.bf16.mxu1 %v3825_v55  ;;  %v3908_v55 = vld [vmem:[#allocation7 + $0xc0] ss:$12 sps:$4 sm:$0xff]  }
  0x7d   :  { %599 = vmatpush2.bf16.msra.mxu0 %v3826_v56  ;;  %v3913_v56 = vld [vmem:[#allocation7 + $0x184] ss:$12 sps:$4 sm:$0xff]  }
  0x7e   :  { %600 = vmatprep.subr.bf16.mxu0 %v3828_v58  ;;  %v3915_v58 = vld [vmem:[#allocation7 + $0x170] ss:$12 sps:$4 sm:$0xff]  }
  0x7f   :  { %3513 = vmatpush3.bf16.msra.mxu1 %v3827_v57  ;;  %v3911_v57 = vld [vmem:[#allocation7 + $0x180] ss:$12 sps:$4 sm:$0xff]  }
  0x80   :  { %3650 = vmatprep.subr.bf16.mxu1 %v4363_v1 }
  0x81   :  { %601 = vmatpush2.bf16.msra.mxu0 %v3830_v61 }
  0x82   :  { %689 = vmatmul.mubr.bf16.vlgmr.msra.gmra.mxu1 %v208_v63  ;;  %602 = vmatprep.subr.bf16.mxu0 %v3832_v62 }
  0x83   :  { %3651 = vmatpush3.bf16.msra.mxu1 %v572_v2  ;;  %3660 = vmatprep.mubr.msk.bf16.mxu1 %vm4364_vm2, %v4363_v1 }
  0x84   :  { %3652 = vmatprep.subr.bf16.mxu1 %v4363_v1 }
  0x85   :  { %603 = vmatpush2.bf16.msra.mxu0 %v3834_v3 }
  0x86   :  { %604 = vmatprep.subr.bf16.mxu0 %v3836_v5 }
  0x87   :  { %3653 = vmatpush3.bf16.msra.mxu1 %v3835_v4 }
  0x88   :  { %3654 = vmatprep.subr.bf16.mxu1 %v4363_v1 }
  0x89   :  { %605 = vmatpush2.bf16.msra.mxu0 %v3838_v6 }
  0x8a   :  { %1278 = vmatprep.subr.bf16.mxu0 %v3844_v11 }
  0x8b   :  { %3655 = vmatpush3.bf16.msra.mxu1 %v3839_v7 }
  0x8c   :  { %3656 = vmatprep.subr.bf16.mxu1 %v4363_v1  ;;  %607 = vmatmul.mubr.bf16.vlgmr.msra.gmra.mxu0 %v208_v63  ;;  %v212_v63 = vlaneseq }
  0x8d   :  { %1279 = vmatpush1.bf16.msra.mxu0 %v3842_v10 }
  0x8e   :  { %1280 = vmatprep.subr.bf16.mxu0 %v3847_v13  ;;  %v213_v4 = vshrl.u32 %v212_v63, 7 }
  0x8f   :  { %3657 = vmatpush3.bf16.msra.mxu1 %v3840_v8 }
  0x90   :  { %3658 = vmatprep.subr.bf16.mxu1 %v4363_v1  ;;  %v4475_v6 = vsub.s32 0, %v213_v4  ;;  %v4477_v8 = vsub.s32 1, %v213_v4  ;;  %v4484_v13 = vsub.s32 2, %v213_v4 }
  0x91   :  { %1281 = vmatpush1.bf16.msra.mxu0 %v3845_v12 }
  0x92   :  { %1282 = vmatprep.subr.bf16.mxu0 %v3850_v14 }
  0x93   :  { %3659 = vmatpush3.bf16.msra.mxu1 %v3841_v9  ;;  %v207_v9 = vld [vmem:[%s4566_s2] sm:$0x7] }
  0x94   :  { %1319 = vmatprep.subr.bf16.mxu1 %v3871_v28  ;;  %v215_v10 = vrot.slane %v207_v9, %v4475_v6  ;;  %v219_v11 = vrot.slane %v207_v9, %v4477_v8 }
  0x95   :  { %1283 = vmatpush1.bf16.msra.mxu0 %v3848_v15 }
  0x96   :  { %3661 = vmatmul.mubr.msk.bf16.vlgmr.msra.gmra.mxu1 %vm560_vm1, %v4459_v26  ;;  %1284 = vmatprep.subr.bf16.mxu0 %v3853_v16  ;;  %v3868_v26 = vld [vmem:[#allocation7 + $0x16c] ss:$12 sps:$4 sm:$0xff]  }
  0x97   :  { %1351 = vmatprep.mubr.bf16.mxu1 %v4362_v0  ;;  %1320 = vmatpush1.bf16.msra.mxu1 %v3869_v29 }
  0x98   :  { %1321 = vmatprep.subr.bf16.mxu1 %v3877_v32 }
  0x99   :  { %1285 = vmatpush1.bf16.msra.mxu0 %v3851_v17 }
  0x9a   :  { %1286 = vmatprep.subr.bf16.mxu0 %v3856_v19 }
  0x9b   :  { %1322 = vmatpush1.bf16.msra.mxu1 %v3875_v33 }
  0x9c   :  { %1323 = vmatprep.subr.bf16.mxu1 %v3883_v36 }
  0x9d   :  { %1287 = vmatpush1.bf16.msra.mxu0 %v3854_v18 }
  0x9e   :  { %1288 = vmatprep.subr.bf16.mxu0 %v3859_v20  ;;  %v223_v20 = vrot.slane %v207_v9, %v4484_v13 }
  0x9f   :  { %1324 = vmatpush1.bf16.msra.mxu1 %v3881_v37 }
  0xa0   :  { %1325 = vmatprep.subr.bf16.mxu1 %v3889_v40 }
  0xa1   :  { %1289 = vmatpush1.bf16.msra.mxu0 %v3857_v21 }
  0xa2   :  { %1290 = vmatprep.subr.bf16.mxu0 %v3862_v22 }
  0xa3   :  { %1326 = vmatpush1.bf16.msra.mxu1 %v3887_v41 }
  0xa4   :  { %1327 = vmatprep.subr.bf16.mxu1 %v3895_v44 }
  0xa5   :  { %1291 = vmatpush1.bf16.msra.mxu0 %v3860_v23 }
  0xa6   :  { %1292 = vmatprep.subr.bf16.mxu0 %v3865_v24 }
  0xa7   :  { %1328 = vmatpush1.bf16.msra.mxu1 %v3893_v45 }
  0xa8   :  { %1329 = vmatprep.subr.bf16.mxu1 %v3901_v48 }
  0xa9   :  { %1293 = vmatpush1.bf16.msra.mxu0 %v3863_v25 }
  0xaa   :  { %1294 = vmatprep.subr.bf16.mxu0 %v3868_v26 }
  0xab   :  { %1330 = vmatpush1.bf16.msra.mxu1 %v3899_v49 }
  0xac   :  { %1331 = vmatprep.subr.bf16.mxu1 %v3907_v52 }
  0xad   :  { %1295 = vmatpush2.bf16.msra.mxu0 %v3866_v27 }
  0xae   :  { %1296 = vmatprep.subr.bf16.mxu0 %v3874_v30 }
  0xaf   :  { %1332 = vmatpush1.bf16.msra.mxu1 %v3905_v53 }
  0xb0   :  { %1333 = vmatprep.subr.bf16.mxu1 %v3913_v56 }
  0xb1   :  { %1297 = vmatpush2.bf16.msra.mxu0 %v3872_v31 }
  0xb2   :  { %1298 = vmatprep.subr.bf16.mxu0 %v3880_v34 }
  0xb3   :  { %1334 = vmatpush1.bf16.msra.mxu1 %v3911_v57 }
  0xb4   :  { %3526 = vmatprep.subr.bf16.mxu1 %v3915_v58 }
  0xb5   :  { %1299 = vmatpush2.bf16.msra.mxu0 %v3878_v35 }
  0xb6   :  { %1300 = vmatprep.subr.bf16.mxu0 %v3886_v38 }
  0xb9   :  { %1301 = vmatpush2.bf16.msra.mxu0 %v3884_v39 }
  0xba   :  { %1302 = vmatprep.subr.bf16.mxu0 %v3892_v42 }
  0xbd   :  { %1303 = vmatpush2.bf16.msra.mxu0 %v3890_v43 }
  0xbe   :  { %1304 = vmatprep.subr.bf16.mxu0 %v3898_v46 }
  0xc1   :  { %1305 = vmatpush2.bf16.msra.mxu0 %v3896_v47 }
  0xc2   :  { %1306 = vmatprep.subr.bf16.mxu0 %v3904_v50 }
  0xc5   :  { %1307 = vmatpush2.bf16.msra.mxu0 %v3902_v51 }
  0xc6   :  { %1308 = vmatprep.subr.bf16.mxu0 %v3910_v54 }
  0xc9   :  { %1309 = vmatpush2.bf16.msra.mxu0 %v3908_v55 }
  0xca   :  { %3664 = vmatprep.subr.bf16.mxu0 %v4363_v1 }
 0x122   :  { %v649_v59 = vpop.f32.mrf.mxu1 }
 0x124   :  { %v651_v60 = vpop.f32.mrf.mxu1 }
 0x126   :  { %v653_v61 = vpop.f32.mrf.mxu1 }
 0x128   :  { %v654_v62 = vpop.f32.mrf.mxu1 }
 0x129   :  { %v3914_v62 = vld [vmem:[#allocation7 + $0x230] ss:$12 sps:$4 sm:$0xff]  }
 0x142   :  { %v3514_v2 = vpop.f32.mrf.mxu1 }
 0x144   :  { %v3515_v3 = vpop.f32.mrf.mxu1 }
 0x145   :  { %v3516_v18 = vadd.f32 %v3515_v3, %v3514_v2 }
 0x146   :  { %v3517_v5 = vpop.f32.mrf.mxu1 }
 0x147   :  { %v691_v26 = vadd.f32 %v3516_v18, %v223_v20  ;;  %v3924_v18 = vld [vmem:[#allocation7 + $0x128] ss:$12 sps:$4 sm:$0xff]   ;;  %v3926_v20 = vld [vmem:[#allocation7 + $0x1d0] ss:$12 sps:$4 sm:$0xff]  }
 0x148   :  { %v3518_v7 = vpop.f32.mrf.mxu1 }
 0x149   :  { %v3916_v7 = vld [vmem:[#allocation7 + $0xb0] ss:$12 sps:$4 sm:$0xff]  }
 0x14c   :  { %v608_v12 = vpop.f32.mrf.mxu0 }
 0x14d   :  { %v609_v14 = vadd.f32 %v608_v12, %v215_v10  ;;  %v3917_v10 = vld [vmem:[#allocation7 + $0x218] ss:$12 sps:$4 sm:$0xff]  }
 0x14e   :  { %v610_v15 = vpop.f32.mrf.mxu0  ;;  %v3919_v12 = vld [vmem:[#allocation7 + $0x98] ss:$12 sps:$4 sm:$0xff]  }
 0x14f   :  { %v650_v16 = vadd.f32 %v649_v59, %v609_v14  ;;  %v611_v17 = vadd.f32 %v610_v15, %v219_v11  ;;  %v3918_v11 = vld [vmem:[#allocation7 + $0x158] ss:$12 sps:$4 sm:$0xff]   ;;  %v3920_v14 = vld [vmem:[#allocation7 + $0x200] ss:$12 sps:$4 sm:$0xff]  }
 0x150   :  { %v612_v19 = vpop.f32.mrf.mxu0  ;;  %v3921_v15 = vld [vmem:[#allocation7 + $0x140] ss:$12 sps:$4 sm:$0xff]  }
 0x151   :  { %v736_v21 = vmin.f32 %v650_v16, 20.0  ;;  %v652_v22 = vadd.f32 %v651_v60, %v611_v17  ;;  %vm739_vm4 = vcmp.gt.f32.partialorder %v650_v16, 20.0  ;;  %v3923_v17 = vld [vmem:[#allocation7 + $0x1e8] ss:$12 sps:$4 sm:$0xff]  }
 0x152   :  { %v613_v23 = vpop.f32.mrf.mxu0  ;;  %v3925_v19 = vld [vmem:[#allocation7 + $0x68] ss:$12 sps:$4 sm:$0xff]  }
 0x153   :  { %v742_v24 = vmul.f32 1.442695, %v736_v21  ;;  %v737_v25 = vmin.f32 %v652_v22, 20.0  ;;  %vm740_vm6 = vcmp.gt.f32.partialorder %v652_v22, 20.0  ;;  %v3927_v21 = vld [vmem:[#allocation7 + $0x110] ss:$12 sps:$4 sm:$0xff]  }
 0x154   :  { %v3929_v23 = vld [vmem:[#allocation7 + $0x1b8] ss:$12 sps:$4 sm:$0xff]  }
 0x155   :  { %4154 = vpow2.f32 %v742_v24  ;;  %v744_v27 = vmul.f32 1.442695, %v737_v25  ;;  %v3930_v24 = vld [vmem:[#allocation7 + $0xf8] ss:$12 sps:$4 sm:$0xff]  }
 0x156   :  { %v730_v28 = vpop.f32.mrf.mxu1  ;;  %v3931_v25 = vld [vmem:[#allocation7 + $0x38] ss:$12 sps:$4 sm:$0xff]  }
 0x157   :  { %v731_v29 = vadd.f32 %v730_v28, %v691_v26  ;;  %4156 = vpow2.f32 %v744_v27  ;;  %v3932_v26 = vld [vmem:[#allocation7 + $0x1a0] ss:$12 sps:$4 sm:$0xff]  }
 0x158   :  { %v3662_v30 = vpop.f32.mrf.mxu1  ;;  %v3933_v27 = vld [vmem:[#allocation7 + $0xe0] ss:$12 sps:$4 sm:$0xff]  }
 0x159   :  { %v738_v31 = vmin.f32 %v731_v29, 20.0  ;;  %vm741_vm8 = vcmp.gt.f32.partialorder %v731_v29, 20.0  ;;  %v3934_v28 = vld [vmem:[#allocation7 + $0x20] ss:$12 sps:$4 sm:$0xff]   ;;  %v3936_v30 = vld [vmem:[#allocation7 + $0xc8] ss:$12 sps:$4 sm:$0xff]  }
 0x15a   :  { %v733_v32 = vpop.f32.mrf.mxu1 }
 0x15b   :  { %v746_v33 = vmul.f32 1.442695, %v738_v31  ;;  %v3937_v31 = vld [vmem:[#allocation7 + $0x8] ss:$12 sps:$4 sm:$0xff]   ;;  %v3940_v32 = vld [vmem:[#allocation8 + $0xac] ss:$12 sps:$4 sm:$0xff]  }
 0x15c   :  { %v3663_v34 = vpop.f32.mrf.mxu1 }
 0x15d   :  { %4158 = vpow2.f32 %v746_v33  ;;  %v3938_v33 = vld [vmem:[#allocation8 + $0xa8] ss:$12 sps:$4 sm:$0xff]  }
 0x15e   :  { %v3943_v34 = vld [vmem:[#allocation8 + $0x94] ss:$12 sps:$4 sm:$0xff]  }
 0x162   :  { %v4155_v35 = vpop.eup %4154 }
 0x163   :  { %v748_v36 = vadd.f32 1.0, %v4155_v35  ;;  %v751_v41 = vmul.f32 -0.5, %v4155_v35  ;;  %v754_v44 = vand.u32 2147483647, %v4155_v35 }
 0x164   :  { %v4157_v37 = vpop.eup %4156 }
 0x165   :  { %4160 = vlog2.f32 %v748_v36  ;;  %v757_v38 = vadd.f32 1.0, %v4157_v37  ;;  %v760_v42 = vmul.f32 -0.5, %v4157_v37  ;;  %v752_v43 = vadd.f32 1.0, %v751_v41  ;;  %v3946_v36 = vld [vmem:[#allocation8 + $0x7c] ss:$12 sps:$4 sm:$0xff]  }
 0x166   :  { %v763_v48 = vand.u32 2147483647, %v4157_v37  ;;  %vm755_vm3 = vcmp.lt.f32.partialorder %v754_v44, 0.0004427343  ;;  %v3952_v41 = vld [vmem:[#allocation8 + $0x4c] ss:$12 sps:$4 sm:$0xff]  }
 0x167   :  { %4162 = vlog2.f32 %v757_v38  ;;  %v761_v45 = vadd.f32 1.0, %v760_v42  ;;  %v753_v50 = vmul.f32 %v4155_v35, %v752_v43  ;;  %v3941_v35 = vld [vmem:[#allocation8 + $0x90] ss:$12 sps:$4 sm:$0xff]   ;;  %v3955_v42 = vld [vmem:[#allocation8 + $0x34] ss:$12 sps:$4 sm:$0xff]  }
 0x168   :  { %vm764_vm5 = vcmp.lt.f32.partialorder %v763_v48, 0.0004427343  ;;  %v3949_v38 = vld [vmem:[#allocation8 + $0x64] ss:$12 sps:$4 sm:$0xff]   ;;  %v3958_v44 = vld [vmem:[#allocation8 + $0x1c] ss:$12 sps:$4 sm:$0xff]  }
 0x169   :  { %v762_v54 = vmul.f32 %v4157_v37, %v761_v45  ;;  %v3944_v37 = vld [vmem:[#allocation8 + $0x78] ss:$12 sps:$4 sm:$0xff]   ;;  %v3953_v43 = vld [vmem:[#allocation8 + $0x30] ss:$12 sps:$4 sm:$0xff]  }
 0x16a   :  { %v4159_v39 = vpop.eup %4158  ;;  %v3956_v45 = vld [vmem:[#allocation8 + $0x18] ss:$12 sps:$4 sm:$0xff]  }
 0x16b   :  { %v766_v40 = vadd.f32 1.0, %v4159_v39  ;;  %v769_v47 = vmul.f32 -0.5, %v4159_v39  ;;  %v772_v57 = vand.u32 2147483647, %v4159_v39  ;;  %v3964_v48 = vld [vmem:[#allocation8 + $0x16c] ss:$12 sps:$4 sm:$0xff]  }
 0x16d   :  { %4164 = vlog2.f32 %v766_v40  ;;  %v770_v55 = vadd.f32 1.0, %v769_v47  ;;  %vm773_vm7 = vcmp.lt.f32.partialorder %v772_v57, 0.0004427343  ;;  %v3950_v40 = vld [vmem:[#allocation8 + $0x48] ss:$12 sps:$4 sm:$0xff]  }
 0x16e   :  { %v3959_v47 = vld [vmem:[#allocation8] ss:$12 sps:$4 sm:$0xff]   ;;  %v3974_v57 = vld [vmem:[#allocation8 + $0x108] ss:$12 sps:$4 sm:$0xff]  }
 0x16f   :  { %v771_v3 = vmul.f32 %v4159_v39, %v770_v55  ;;  %v3947_v39 = vld [vmem:[#allocation8 + $0x60] ss:$12 sps:$4 sm:$0xff]  }
 0x170   :  { %v3971_v55 = vld [vmem:[#allocation8 + $0x120] ss:$12 sps:$4 sm:$0xff]  }
 0x172   :  { %v4161_v46 = vpop.eup %4160 }
 0x173   :  { %v750_v49 = vmul.f32 0.6931472, %v4161_v46  ;;  %v3961_v46 = vld [vmem:[#allocation8 + $0x4] ss:$12 sps:$4 sm:$0xff]  }
 0x174   :  { %v4163_v51 = vpop.eup %4162 }
 0x175   :  { %v756_v52 = vsel %vm755_vm3, %v753_v50, %v750_v49  ;;  %v759_v53 = vmul.f32 0.6931472, %v4163_v51  ;;  %v3962_v49 = vld [vmem:[#allocation8 + $0x168] ss:$12 sps:$4 sm:$0xff]   ;;  %v3965_v51 = vld [vmem:[#allocation8 + $0x150] ss:$12 sps:$4 sm:$0xff]  }
 0x176   :  { %v775_v56 = vsel %vm739_vm4, %v650_v16, %v756_v52  ;;  %v3922_v16 = vld [vmem:[#allocation7 + $0x80] ss:$12 sps:$4 sm:$0xff]   ;;  %v3970_v52 = vld [vmem:[#allocation8 + $0x13c] ss:$12 sps:$4 sm:$0xff]  }
 0x177   :  { %v765_v58 = vsel %vm764_vm5, %v762_v54, %v759_v53  ;;  %v4487_v63 = vpack.c.bf16 %v775_v56, %v775_v56  ;;  %v3967_v50 = vld [vmem:[#allocation8 + $0x154] ss:$12 sps:$4 sm:$0xff]   ;;  %v3968_v53 = vld [vmem:[#allocation8 + $0x138] ss:$12 sps:$4 sm:$0xff]  }
 0x178   :  { %v776_v59 = vsel %vm740_vm6, %v652_v22, %v765_v58  ;;  %v3928_v22 = vld [vmem:[#allocation7 + $0x50] ss:$12 sps:$4 sm:$0xff]   ;;  %v3976_v56 = vld [vmem:[#allocation8 + $0x10c] ss:$12 sps:$4 sm:$0xff]   ;;  %v3979_v58 = vld [vmem:[#allocation8 + $0xf4] ss:$12 sps:$4 sm:$0xff]  }
 0x179   :  { %v876_v61 = vpack.c.bf16 %v776_v59, %v776_v59  ;;  %v3973_v54 = vld [vmem:[#allocation8 + $0x124] ss:$12 sps:$4 sm:$0xff]  }
 0x17a   :  { %v4165_v60 = vpop.eup %4164  ;;  %v3977_v59 = vld [vmem:[#allocation8 + $0xf0] ss:$12 sps:$4 sm:$0xff]  }
 0x17b   :  { %v768_v2 = vmul.f32 0.6931472, %v4165_v60  ;;  %1310 = vmatprep.mubr.bf16.mxu0 %v876_v61  ;;  %v3982_v60 = vld [vmem:[#allocation8 + $0xdc] ss:$12 sps:$4 sm:$0xff]  }
 0x17c   :  { %1311 = vmatmul.mubr.bf16.vlgmr.msra.gmra.mxu0 %v4487_v63 }
 0x17d   :  { %v774_v4 = vsel %vm773_vm7, %v771_v3, %v768_v2  ;;  %3665 = vmatpush3.bf16.msra.mxu0 %v3914_v62  ;;  %3680 = vmatprep.mubr.msk.bf16.mxu0 %vm4364_vm2, %v4363_v1  ;;  %v3985_v62 = vld [vmem:[#allocation8 + $0xc4] ss:$12 sps:$4 sm:$0xff]   ;;  %v3986_v2 = vld [vmem:[#allocation8 + $0x228] ss:$12 sps:$4 sm:$0xff]   ;;  %v3988_v3 = vld [vmem:[#allocation8 + $0x22c] ss:$12 sps:$4 sm:$0xff]  }
 0x17e   :  { %v777_v5 = vsel %vm741_vm8, %v731_v29, %v774_v4  ;;  %3666 = vmatprep.subr.bf16.mxu0 %v4363_v1  ;;  %v3935_v29 = vld [vmem:[#allocation7 + $0x188] ss:$12 sps:$4 sm:$0xff]  }
 0x17f   :  { %v877_v9 = vpack.c.bf16 %v777_v5, %v777_v5  ;;  %v3992_v4 = vld [vmem:[#allocation8 + $0x214] ss:$12 sps:$4 sm:$0xff]   ;;  %v3990_v5 = vld [vmem:[#allocation8 + $0x210] ss:$12 sps:$4 sm:$0xff]  }
 0x181   :  { %1352 = vmatmul.mubr.bf16.vlgmr.msra.gmra.mxu1 %v877_v9  ;;  %3667 = vmatpush3.bf16.msra.mxu0 %v3917_v10  ;;  %v4000_v10 = vld [vmem:[#allocation8 + $0x1e4] ss:$12 sps:$4 sm:$0xff]  }
 0x182   :  { %3527 = vmatpush3.bf16.msra.mxu1 %v3916_v7  ;;  %1392 = vmatprep.mubr.bf16.mxu1 %v876_v61  ;;  %v3980_v61 = vld [vmem:[#allocation8 + $0xd8] ss:$12 sps:$4 sm:$0xff]   ;;  %v3996_v7 = vld [vmem:[#allocation8 + $0x1fc] ss:$12 sps:$4 sm:$0xff]  }
 0x183   :  { %3528 = vmatprep.subr.bf16.mxu1 %v3918_v11  ;;  %3668 = vmatprep.subr.bf16.mxu0 %v4363_v1  ;;  %v3998_v11 = vld [vmem:[#allocation8 + $0x1e0] ss:$12 sps:$4 sm:$0xff]  }
 0x185   :  { %3669 = vmatpush3.bf16.msra.mxu0 %v3920_v14  ;;  %v4002_v14 = vld [vmem:[#allocation8 + $0x1c8] ss:$12 sps:$4 sm:$0xff]  }
 0x186   :  { %3529 = vmatpush3.bf16.msra.mxu1 %v3919_v12  ;;  %3670 = vmatprep.subr.bf16.mxu0 %v4363_v1  ;;  %v4004_v12 = vld [vmem:[#allocation8 + $0x1cc] ss:$12 sps:$4 sm:$0xff]  }
 0x187   :  { %3530 = vmatprep.subr.bf16.mxu1 %v3921_v15  ;;  %v4008_v15 = vld [vmem:[#allocation8 + $0x1b4] ss:$12 sps:$4 sm:$0xff]  }
 0x189   :  { %3671 = vmatpush3.bf16.msra.mxu0 %v3923_v17  ;;  %v4012_v17 = vld [vmem:[#allocation8 + $0x19c] ss:$12 sps:$4 sm:$0xff]  }
 0x18a   :  { %3531 = vmatpush3.bf16.msra.mxu1 %v3922_v16  ;;  %3672 = vmatprep.subr.bf16.mxu0 %v4363_v1  ;;  %v4006_v16 = vld [vmem:[#allocation8 + $0x1b0] ss:$12 sps:$4 sm:$0xff]  }
 0x18b   :  { %3532 = vmatprep.subr.bf16.mxu1 %v3924_v18  ;;  %v4010_v18 = vld [vmem:[#allocation8 + $0x198] ss:$12 sps:$4 sm:$0xff]  }
 0x18d   :  { %3673 = vmatpush3.bf16.msra.mxu0 %v3926_v20  ;;  %v4014_v20 = vld [vmem:[#allocation8 + $0x180] ss:$12 sps:$4 sm:$0xff]  }
 0x18e   :  { %3533 = vmatpush3.bf16.msra.mxu1 %v3925_v19  ;;  %3674 = vmatprep.subr.bf16.mxu0 %v4363_v1  ;;  %v4016_v19 = vld [vmem:[#allocation8 + $0x184] ss:$12 sps:$4 sm:$0xff]  }
 0x18f   :  { %3534 = vmatprep.subr.bf16.mxu1 %v3927_v21  ;;  %v4018_v21 = vld [vmem:[#allocation8 + $0x170] ss:$12 sps:$4 sm:$0xff]  }
 0x191   :  { %3675 = vmatpush3.bf16.msra.mxu0 %v3929_v23 }
 0x192   :  { %3535 = vmatpush3.bf16.msra.mxu1 %v3928_v22  ;;  %3676 = vmatprep.subr.bf16.mxu0 %v4363_v1  ;;  %v874_v22 = vld [vmem:[%s4568_s4] sm:$0x7] }
 0x193   :  { %3536 = vmatprep.subr.bf16.mxu1 %v3930_v24  ;;  %v882_v23 = vrot.slane %v874_v22, %v4475_v6  ;;  %v886_v24 = vrot.slane %v874_v22, %v4477_v8 }
 0x195   :  { %3677 = vmatpush3.bf16.msra.mxu0 %v3932_v26 }
 0x196   :  { %3537 = vmatpush3.bf16.msra.mxu1 %v3931_v25  ;;  %3678 = vmatprep.subr.bf16.mxu0 %v4363_v1 }
 0x197   :  { %3538 = vmatprep.subr.bf16.mxu1 %v3933_v27 }
 0x199   :  { %3679 = vmatpush3.bf16.msra.mxu0 %v3935_v29 }
 0x19a   :  { %3539 = vmatpush3.bf16.msra.mxu1 %v3934_v28  ;;  %2023 = vmatprep.subr.bf16.mxu0 %v3988_v3 }
 0x19b   :  { %3540 = vmatprep.subr.bf16.mxu1 %v3936_v30 }
 0x19c   :  { %3681 = vmatmul.mubr.bf16.vlgmr.msra.gmra.mxu0 %v877_v9  ;;  %v3994_v9 = vld [vmem:[#allocation8 + $0x1f8] ss:$12 sps:$4 sm:$0xff]  }
 0x19d   :  { %2055 = vmatprep.mubr.bf16.mxu0 %v4362_v0  ;;  %2024 = vmatpush1.bf16.msra.mxu0 %v3986_v2 }
 0x19e   :  { %3541 = vmatpush3.bf16.msra.mxu1 %v3937_v31  ;;  %2025 = vmatprep.subr.bf16.mxu0 %v3992_v4 }
 0x19f   :  { %1982 = vmatprep.subr.bf16.mxu1 %v3940_v32 }
 0x1a1   :  { %1393 = vmatmul.mubr.bf16.vlgmr.msra.gmra.mxu1 %v4487_v63  ;;  %v3983_v63 = vld [vmem:[#allocation8 + $0xc0] ss:$12 sps:$4 sm:$0xff]   ;;  %2026 = vmatpush1.bf16.msra.mxu0 %v3990_v5 }
 0x1a2   :  { %1983 = vmatpush1.bf16.msra.mxu1 %v3938_v33  ;;  %2027 = vmatprep.subr.bf16.mxu0 %v3996_v7 }
 0x1a3   :  { %1984 = vmatprep.subr.bf16.mxu1 %v3943_v34 }
 0x1a5   :  { %2028 = vmatpush1.bf16.msra.mxu0 %v3994_v9 }
 0x1a6   :  { %1985 = vmatpush1.bf16.msra.mxu1 %v3941_v35  ;;  %2029 = vmatprep.subr.bf16.mxu0 %v4000_v10 }
 0x1a7   :  { %1986 = vmatprep.subr.bf16.mxu1 %v3946_v36 }
 0x1a9   :  { %2030 = vmatpush1.bf16.msra.mxu0 %v3998_v11 }
 0x1aa   :  { %1987 = vmatpush1.bf16.msra.mxu1 %v3944_v37  ;;  %2031 = vmatprep.subr.bf16.mxu0 %v4004_v12 }
 0x1ab   :  { %1988 = vmatprep.subr.bf16.mxu1 %v3949_v38 }
 0x1ad   :  { %2032 = vmatpush1.bf16.msra.mxu0 %v4002_v14 }
 0x1ae   :  { %1989 = vmatpush1.bf16.msra.mxu1 %v3947_v39  ;;  %2033 = vmatprep.subr.bf16.mxu0 %v4008_v15 }
 0x1af   :  { %1990 = vmatprep.subr.bf16.mxu1 %v3952_v41 }
 0x1b1   :  { %2034 = vmatpush1.bf16.msra.mxu0 %v4006_v16 }
 0x1b2   :  { %1991 = vmatpush1.bf16.msra.mxu1 %v3950_v40  ;;  %2035 = vmatprep.subr.bf16.mxu0 %v4012_v17  ;;  %v3989_v17 = vld [vmem:[#allocation8 + $0x230] ss:$12 sps:$4 sm:$0xff]  }
 0x1b3   :  { %1992 = vmatprep.subr.bf16.mxu1 %v3955_v42 }
 0x1b5   :  { %2036 = vmatpush1.bf16.msra.mxu0 %v4010_v18 }
 0x1b6   :  { %1993 = vmatpush1.bf16.msra.mxu1 %v3953_v43  ;;  %2037 = vmatprep.subr.bf16.mxu0 %v4016_v19  ;;  %v3993_v19 = vld [vmem:[#allocation8 + $0x218] ss:$12 sps:$4 sm:$0xff]  }
 0x1b7   :  { %1994 = vmatprep.subr.bf16.mxu1 %v3958_v44 }
 0x1b9   :  { %2038 = vmatpush1.bf16.msra.mxu0 %v4014_v20  ;;  %v3997_v20 = vld [vmem:[#allocation8 + $0x200] ss:$12 sps:$4 sm:$0xff]  }
 0x1ba   :  { %1995 = vmatpush1.bf16.msra.mxu1 %v3956_v45  ;;  %3557 = vmatprep.subr.bf16.mxu0 %v4018_v21  ;;  %v4001_v21 = vld [vmem:[#allocation8 + $0x1e8] ss:$12 sps:$4 sm:$0xff]  }
 0x1bb   :  { %1996 = vmatprep.subr.bf16.mxu1 %v3961_v46 }
 0x1be   :  { %1997 = vmatpush1.bf16.msra.mxu1 %v3959_v47 }
 0x1bf   :  { %1998 = vmatprep.subr.bf16.mxu1 %v3964_v48 }
 0x1c2   :  { %1999 = vmatpush2.bf16.msra.mxu1 %v3962_v49 }
 0x1c3   :  { %2000 = vmatprep.subr.bf16.mxu1 %v3967_v50 }
 0x1c6   :  { %2001 = vmatpush2.bf16.msra.mxu1 %v3965_v51 }
 0x1c7   :  { %2002 = vmatprep.subr.bf16.mxu1 %v3970_v52  ;;  %v890_v52 = vrot.slane %v874_v22, %v4484_v13 }
 0x1ca   :  { %2003 = vmatpush2.bf16.msra.mxu1 %v3968_v53 }
 0x1cb   :  { %2004 = vmatprep.subr.bf16.mxu1 %v3973_v54 }
 0x1ce   :  { %2005 = vmatpush2.bf16.msra.mxu1 %v3971_v55 }
 0x1cf   :  { %2006 = vmatprep.subr.bf16.mxu1 %v3976_v56 }
 0x1d2   :  { %2007 = vmatpush2.bf16.msra.mxu1 %v3974_v57 }
 0x1d3   :  { %2008 = vmatprep.subr.bf16.mxu1 %v3979_v58 }
 0x1d6   :  { %2009 = vmatpush2.bf16.msra.mxu1 %v3977_v59 }
 0x1d7   :  { %2010 = vmatprep.subr.bf16.mxu1 %v3982_v60 }
 0x1da   :  { %2011 = vmatpush2.bf16.msra.mxu1 %v3980_v61 }
 0x1db   :  { %2012 = vmatprep.subr.bf16.mxu1 %v3985_v62 }
 0x1de   :  { %2013 = vmatpush2.bf16.msra.mxu1 %v3983_v63 }
 0x1df   :  { %3684 = vmatprep.subr.bf16.mxu1 %v4363_v1 }
 0x23c   :  { %v1312_v25 = vpop.f32.mrf.mxu0 }
 0x23d   :  { %v1313_v26 = vadd.f32 %v1312_v25, %v882_v23  ;;  %v4005_v23 = vld [vmem:[#allocation8 + $0x1d0] ss:$12 sps:$4 sm:$0xff]   ;;  %v4009_v25 = vld [vmem:[#allocation8 + $0x1b8] ss:$12 sps:$4 sm:$0xff]  }
 0x23e   :  { %v1314_v27 = vpop.f32.mrf.mxu0 }
 0x23f   :  { %v1315_v28 = vadd.f32 %v1314_v27, %v886_v24 }
 0x240   :  { %v1316_v30 = vpop.f32.mrf.mxu0 }
 0x241   :  { %v1353_v29 = vpop.f32.mrf.mxu1 }
 0x242   :  { %v1354_v31 = vadd.f32 %v1353_v29, %v1313_v26  ;;  %v1317_v33 = vpop.f32.mrf.mxu0  ;;  %v4013_v26 = vld [vmem:[#allocation8 + $0x1a0] ss:$12 sps:$4 sm:$0xff]  }
 0x243   :  { %v1355_v32 = vpop.f32.mrf.mxu1 }
 0x244   :  { %v1440_v34 = vmin.f32 %v1354_v31, 20.0  ;;  %v1356_v35 = vadd.f32 %v1355_v32, %v1315_v28  ;;  %vm1443_vm10 = vcmp.gt.f32.partialorder %v1354_v31, 20.0  ;;  %v4017_v28 = vld [vmem:[#allocation8 + $0x188] ss:$12 sps:$4 sm:$0xff]  }
 0x245   :  { %v1357_v36 = vpop.f32.mrf.mxu1 }
 0x246   :  { %v1446_v37 = vmul.f32 1.442695, %v1440_v34  ;;  %v1441_v38 = vmin.f32 %v1356_v35, 20.0  ;;  %vm1444_vm12 = vcmp.gt.f32.partialorder %v1356_v35, 20.0  ;;  %v4019_v36 = vld [vmem:[#allocation8 + $0xb0] ss:$12 sps:$4 sm:$0xff]  }
 0x247   :  { %v1358_v39 = vpop.f32.mrf.mxu1 }
 0x248   :  { %4166 = vpow2.f32 %v1446_v37  ;;  %v1448_v40 = vmul.f32 1.442695, %v1441_v38  ;;  %v4020_v38 = vld [vmem:[#allocation8 + $0x158] ss:$12 sps:$4 sm:$0xff]  }
 0x249   :  { %v4021_v39 = vld [vmem:[#allocation8 + $0x98] ss:$12 sps:$4 sm:$0xff]  }
 0x24a   :  { %4168 = vpow2.f32 %v1448_v40  ;;  %v4022_v40 = vld [vmem:[#allocation8 + $0x140] ss:$12 sps:$4 sm:$0xff]  }
 0x255   :  { %v4167_v41 = vpop.eup %4166 }
 0x256   :  { %v1452_v42 = vadd.f32 1.0, %v4167_v41  ;;  %v1455_v45 = vmul.f32 -0.5, %v4167_v41  ;;  %v1458_v53 = vand.u32 2147483647, %v4167_v41 }
 0x257   :  { %v4169_v43 = vpop.eup %4168 }
 0x258   :  { %4170 = vlog2.f32 %v1452_v42  ;;  %v1461_v44 = vadd.f32 1.0, %v4169_v43  ;;  %v1464_v48 = vmul.f32 -0.5, %v4169_v43  ;;  %v1456_v50 = vadd.f32 1.0, %v1455_v45  ;;  %v4024_v42 = vld [vmem:[#allocation8 + $0x128] ss:$12 sps:$4 sm:$0xff]  }
 0x259   :  { %v1467_v60 = vand.u32 2147483647, %v4169_v43  ;;  %vm1459_vm9 = vcmp.lt.f32.partialorder %v1458_v53, 0.0004427343  ;;  %v4027_v45 = vld [vmem:[#allocation8 + $0x50] ss:$12 sps:$4 sm:$0xff]  }
 0x25a   :  { %4172 = vlog2.f32 %v1461_v44  ;;  %v1465_v57 = vadd.f32 1.0, %v1464_v48  ;;  %v1457_v62 = vmul.f32 %v4167_v41, %v1456_v50  ;;  %v4023_v41 = vld [vmem:[#allocation8 + $0x80] ss:$12 sps:$4 sm:$0xff]   ;;  %v4026_v44 = vld [vmem:[#allocation8 + $0x110] ss:$12 sps:$4 sm:$0xff]  }
 0x25b   :  { %vm1468_vm11 = vcmp.lt.f32.partialorder %v1467_v60, 0.0004427343  ;;  %v4030_v48 = vld [vmem:[#allocation8 + $0xe0] ss:$12 sps:$4 sm:$0xff]   ;;  %v4033_v50 = vld [vmem:[#allocation8 + $0x8] ss:$12 sps:$4 sm:$0xff]  }
 0x25c   :  { %v1434_v46 = vpop.f32.mrf.mxu0  ;;  %v1466_v9 = vmul.f32 %v4169_v43, %v1465_v57  ;;  %v4025_v43 = vld [vmem:[#allocation8 + $0x68] ss:$12 sps:$4 sm:$0xff]   ;;  %v4045_v57 = vld [vmem:[#allocation10 + $0x64] ss:$12 sps:$4 sm:$0xff]  }
 0x25d   :  { %v4039_v53 = vld [vmem:[#allocation10 + $0x94] ss:$12 sps:$4 sm:$0xff]  }
 0x25e   :  { %v3682_v47 = vpop.f32.mrf.mxu0  ;;  %v4046_v60 = vld [vmem:[#allocation10 + $0x48] ss:$12 sps:$4 sm:$0xff]  }
 0x25f   :  { %v4029_v47 = vld [vmem:[#allocation8 + $0x38] ss:$12 sps:$4 sm:$0xff]  }
 0x260   :  { %v1437_v51 = vpop.f32.mrf.mxu0 }
 0x261   :  { %v3542_v49 = vpop.f32.mrf.mxu1  ;;  %v4034_v51 = vld [vmem:[#allocation10 + $0xa8] ss:$12 sps:$4 sm:$0xff]  }
 0x262   :  { %v3683_v56 = vpop.f32.mrf.mxu0 }
 0x263   :  { %v3543_v54 = vpop.f32.mrf.mxu1  ;;  %v4040_v56 = vld [vmem:[#allocation10 + $0x78] ss:$12 sps:$4 sm:$0xff]  }
 0x264   :  { %v3544_v55 = vadd.f32 %v3543_v54, %v3542_v49  ;;  %v4031_v49 = vld [vmem:[#allocation8 + $0x20] ss:$12 sps:$4 sm:$0xff]   ;;  %v4037_v54 = vld [vmem:[#allocation10 + $0x90] ss:$12 sps:$4 sm:$0xff]  }
 0x265   :  { %v4171_v58 = vpop.eup %4170  ;;  %v3545_v59 = vpop.f32.mrf.mxu1 }
 0x266   :  { %v1454_v61 = vmul.f32 0.6931472, %v4171_v58  ;;  %v1395_v63 = vadd.f32 %v3544_v55, %v890_v52  ;;  %v4036_v52 = vld [vmem:[#allocation10 + $0xac] ss:$12 sps:$4 sm:$0xff]   ;;  %v4042_v55 = vld [vmem:[#allocation10 + $0x7c] ss:$12 sps:$4 sm:$0xff]  }
 0x267   :  { %v4173_v2 = vpop.eup %4172  ;;  %v3546_v3 = vpop.f32.mrf.mxu1  ;;  %v4043_v58 = vld [vmem:[#allocation10 + $0x60] ss:$12 sps:$4 sm:$0xff]  }
 0x268   :  { %v1460_v4 = vsel %vm1459_vm9, %v1457_v62, %v1454_v61  ;;  %v1435_v5 = vadd.f32 %v1434_v46, %v1395_v63  ;;  %v1463_v7 = vmul.f32 0.6931472, %v4173_v2  ;;  %v4028_v46 = vld [vmem:[#allocation8 + $0xf8] ss:$12 sps:$4 sm:$0xff]   ;;  %v4051_v61 = vld [vmem:[#allocation10 + $0x34] ss:$12 sps:$4 sm:$0xff]  }
 0x269   :  { %v1479_v10 = vsel %vm1443_vm10, %v1354_v31, %v1460_v4  ;;  %v4048_v59 = vld [vmem:[#allocation10 + $0x4c] ss:$12 sps:$4 sm:$0xff]   ;;  %v4049_v62 = vld [vmem:[#allocation10 + $0x30] ss:$12 sps:$4 sm:$0xff]  }
 0x26a   :  { %v1442_v11 = vmin.f32 %v1435_v5, 20.0  ;;  %v1469_v12 = vsel %vm1468_vm11, %v1466_v9, %v1463_v7  ;;  %v4508_v18 = vpack.c.bf16 %v1479_v10, %v1479_v10  ;;  %vm1445_vm14 = vcmp.gt.f32.partialorder %v1435_v5, 20.0  ;;  %v4054_v63 = vld [vmem:[#allocation10 + $0x1c] ss:$12 sps:$4 sm:$0xff]   ;;  %v4052_v2 = vld [vmem:[#allocation10 + $0x18] ss:$12 sps:$4 sm:$0xff]  }
 0x26b   :  { %v1480_v14 = vsel %vm1444_vm12, %v1356_v35, %v1469_v12  ;;  %v4057_v3 = vld [vmem:[#allocation10 + $0x4] ss:$12 sps:$4 sm:$0xff]   ;;  %v4055_v4 = vld [vmem:[#allocation10] ss:$12 sps:$4 sm:$0xff]   ;;  %v4058_v7 = vld [vmem:[#allocation10 + $0x168] ss:$12 sps:$4 sm:$0xff]  }
 0x26c   :  { %v1450_v15 = vmul.f32 1.442695, %v1442_v11  ;;  %v1580_v16 = vpack.c.bf16 %v1480_v14, %v1480_v14  ;;  %v4063_v9 = vld [vmem:[#allocation10 + $0x154] ss:$12 sps:$4 sm:$0xff]   ;;  %v4061_v10 = vld [vmem:[#allocation10 + $0x150] ss:$12 sps:$4 sm:$0xff]  }
 0x26d   :  { %v4066_v11 = vld [vmem:[#allocation10 + $0x13c] ss:$12 sps:$4 sm:$0xff]   ;;  %v4064_v12 = vld [vmem:[#allocation10 + $0x138] ss:$12 sps:$4 sm:$0xff]  }
 0x26e   :  { %4174 = vpow2.f32 %v1450_v15  ;;  %2014 = vmatprep.mubr.bf16.mxu1 %v1580_v16  ;;  %v4069_v14 = vld [vmem:[#allocation10 + $0x124] ss:$12 sps:$4 sm:$0xff]   ;;  %v4067_v15 = vld [vmem:[#allocation10 + $0x120] ss:$12 sps:$4 sm:$0xff]  }
 0x26f   :  { %2015 = vmatmul.mubr.bf16.vlgmr.msra.gmra.mxu1 %v4508_v18 }
 0x270   :  { %3685 = vmatpush3.bf16.msra.mxu1 %v3989_v17  ;;  %3700 = vmatprep.mubr.msk.bf16.mxu1 %vm4364_vm2, %v4363_v1  ;;  %v4070_v17 = vld [vmem:[#allocation10 + $0x108] ss:$12 sps:$4 sm:$0xff]  }
 0x271   :  { %3686 = vmatprep.subr.bf16.mxu1 %v4363_v1 }
 0x274   :  { %3687 = vmatpush3.bf16.msra.mxu1 %v3993_v19  ;;  %v4073_v19 = vld [vmem:[#allocation10 + $0xf0] ss:$12 sps:$4 sm:$0xff]  }
 0x275   :  { %3688 = vmatprep.subr.bf16.mxu1 %v4363_v1 }
 0x278   :  { %3689 = vmatpush3.bf16.msra.mxu1 %v3997_v20  ;;  %v4078_v20 = vld [vmem:[#allocation10 + $0xdc] ss:$12 sps:$4 sm:$0xff]  }
 0x279   :  { %3690 = vmatprep.subr.bf16.mxu1 %v4363_v1 }
 0x27b   :  { %v4175_v22 = vpop.eup %4174 }
 0x27c   :  { %3691 = vmatpush3.bf16.msra.mxu1 %v4001_v21  ;;  %v1470_v24 = vadd.f32 1.0, %v4175_v22  ;;  %v1473_v27 = vmul.f32 -0.5, %v4175_v22  ;;  %v1476_v30 = vand.u32 2147483647, %v4175_v22  ;;  %v4076_v21 = vld [vmem:[#allocation10 + $0xd8] ss:$12 sps:$4 sm:$0xff]  }
 0x27d   :  { %3692 = vmatprep.subr.bf16.mxu1 %v4363_v1 }
 0x27e   :  { %4176 = vlog2.f32 %v1470_v24  ;;  %v1474_v29 = vadd.f32 1.0, %v1473_v27  ;;  %vm1477_vm13 = vcmp.lt.f32.partialorder %v1476_v30, 0.0004427343  ;;  %v4082_v24 = vld [vmem:[#allocation10 + $0x228] ss:$12 sps:$4 sm:$0xff]  }
 0x27f   :  { %v4086_v27 = vld [vmem:[#allocation10 + $0x210] ss:$12 sps:$4 sm:$0xff]  }
 0x280   :  { %3693 = vmatpush3.bf16.msra.mxu1 %v4005_v23  ;;  %v1475_v33 = vmul.f32 %v4175_v22, %v1474_v29  ;;  %v4081_v22 = vld [vmem:[#allocation10 + $0xc4] ss:$12 sps:$4 sm:$0xff]   ;;  %v4079_v23 = vld [vmem:[#allocation10 + $0xc0] ss:$12 sps:$4 sm:$0xff]  }
 0x281   :  { %3694 = vmatprep.subr.bf16.mxu1 %v4363_v1  ;;  %v4090_v29 = vld [vmem:[#allocation10 + $0x1f8] ss:$12 sps:$4 sm:$0xff]  }
 0x282   :  { %v4096_v30 = vld [vmem:[#allocation10 + $0x1e4] ss:$12 sps:$4 sm:$0xff]  }
 0x284   :  { %3695 = vmatpush3.bf16.msra.mxu1 %v4009_v25  ;;  %v4084_v25 = vld [vmem:[#allocation10 + $0x22c] ss:$12 sps:$4 sm:$0xff]  }
 0x285   :  { %3696 = vmatprep.subr.bf16.mxu1 %v4363_v1 }
 0x288   :  { %3697 = vmatpush3.bf16.msra.mxu1 %v4013_v26  ;;  %v4088_v26 = vld [vmem:[#allocation10 + $0x214] ss:$12 sps:$4 sm:$0xff]  }
 0x289   :  { %3698 = vmatprep.subr.bf16.mxu1 %v4363_v1 }
 0x28b   :  { %v4177_v31 = vpop.eup %4176 }
 0x28c   :  { %3699 = vmatpush3.bf16.msra.mxu1 %v4017_v28  ;;  %v1472_v32 = vmul.f32 0.6931472, %v4177_v31  ;;  %v4092_v28 = vld [vmem:[#allocation10 + $0x1fc] ss:$12 sps:$4 sm:$0xff]   ;;  %v4094_v31 = vld [vmem:[#allocation10 + $0x1e0] ss:$12 sps:$4 sm:$0xff]  }
 0x28d   :  { %2727 = vmatprep.subr.bf16.mxu1 %v4084_v25 }
 0x28e   :  { %v1478_v34 = vsel %vm1477_vm13, %v1475_v33, %v1472_v32  ;;  %v4100_v32 = vld [vmem:[#allocation10 + $0x1cc] ss:$12 sps:$4 sm:$0xff]   ;;  %v4098_v33 = vld [vmem:[#allocation10 + $0x1c8] ss:$12 sps:$4 sm:$0xff]  }
 0x28f   :  { %v1481_v35 = vsel %vm1445_vm14, %v1435_v5, %v1478_v34  ;;  %v4060_v5 = vld [vmem:[#allocation10 + $0x16c] ss:$12 sps:$4 sm:$0xff]   ;;  %v4104_v34 = vld [vmem:[#allocation10 + $0x1b4] ss:$12 sps:$4 sm:$0xff]  }
 0x290   :  { %v1581_v37 = vpack.c.bf16 %v1481_v35, %v1481_v35  ;;  %v4102_v35 = vld [vmem:[#allocation10 + $0x1b0] ss:$12 sps:$4 sm:$0xff]  }
 0x292   :  { %2056 = vmatmul.mubr.bf16.vlgmr.msra.gmra.mxu0 %v1581_v37  ;;  %3701 = vmatmul.mubr.bf16.vlgmr.msra.gmra.mxu1 %v1581_v37  ;;  %v4106_v37 = vld [vmem:[#allocation10 + $0x198] ss:$12 sps:$4 sm:$0xff]  }
 0x293   :  { %3558 = vmatpush3.bf16.msra.mxu0 %v4019_v36  ;;  %2096 = vmatprep.mubr.bf16.mxu0 %v1580_v16  ;;  %v4072_v16 = vld [vmem:[#allocation10 + $0x10c] ss:$12 sps:$4 sm:$0xff]   ;;  %v4108_v36 = vld [vmem:[#allocation10 + $0x19c] ss:$12 sps:$4 sm:$0xff]  }
 0x294   :  { %3559 = vmatprep.subr.bf16.mxu0 %v4020_v38  ;;  %2759 = vmatprep.mubr.bf16.mxu1 %v4362_v0  ;;  %v4032_v0 = vld [vmem:[#allocation8 + $0xc8] ss:$12 sps:$4 sm:$0xff]   ;;  %v4112_v38 = vld [vmem:[#allocation10 + $0x184] ss:$12 sps:$4 sm:$0xff]  }
 0x295   :  { %2728 = vmatpush1.bf16.msra.mxu1 %v4082_v24 }
 0x296   :  { %2729 = vmatprep.subr.bf16.mxu1 %v4088_v26 }
 0x297   :  { %3560 = vmatpush3.bf16.msra.mxu0 %v4021_v39  ;;  %v4110_v39 = vld [vmem:[#allocation10 + $0x180] ss:$12 sps:$4 sm:$0xff]  }
 0x298   :  { %3561 = vmatprep.subr.bf16.mxu0 %v4022_v40  ;;  %v4114_v40 = vld [vmem:[#allocation10 + $0x170] ss:$12 sps:$4 sm:$0xff]  }
 0x299   :  { %2730 = vmatpush1.bf16.msra.mxu1 %v4086_v27 }
 0x29a   :  { %2731 = vmatprep.subr.bf16.mxu1 %v4092_v28 }
 0x29b   :  { %3562 = vmatpush3.bf16.msra.mxu0 %v4023_v41 }
 0x29c   :  { %3563 = vmatprep.subr.bf16.mxu0 %v4024_v42 }
 0x29d   :  { %2732 = vmatpush1.bf16.msra.mxu1 %v4090_v29 }
 0x29e   :  { %2733 = vmatprep.subr.bf16.mxu1 %v4096_v30 }
 0x29f   :  { %3564 = vmatpush3.bf16.msra.mxu0 %v4025_v43 }
 0x2a0   :  { %3565 = vmatprep.subr.bf16.mxu0 %v4026_v44 }
 0x2a1   :  { %2734 = vmatpush1.bf16.msra.mxu1 %v4094_v31 }
 0x2a2   :  { %2735 = vmatprep.subr.bf16.mxu1 %v4100_v32 }
 0x2a3   :  { %3566 = vmatpush3.bf16.msra.mxu0 %v4027_v45  ;;  %v1578_v45 = vld [vmem:[%s4570_s6] sm:$0x7] }
 0x2a4   :  { %3567 = vmatprep.subr.bf16.mxu0 %v4028_v46  ;;  %v1586_v46 = vrot.slane %v1578_v45, %v4475_v6 }
 0x2a5   :  { %2736 = vmatpush1.bf16.msra.mxu1 %v4098_v33 }
 0x2a6   :  { %2737 = vmatprep.subr.bf16.mxu1 %v4104_v34 }
 0x2a7   :  { %3568 = vmatpush3.bf16.msra.mxu0 %v4029_v47  ;;  %v1590_v47 = vrot.slane %v1578_v45, %v4477_v8 }
 0x2a8   :  { %3569 = vmatprep.subr.bf16.mxu0 %v4030_v48 }
 0x2a9   :  { %2738 = vmatpush1.bf16.msra.mxu1 %v4102_v35  ;;  %v4085_v35 = vld [vmem:[#allocation10 + $0x230] ss:$12 sps:$4 sm:$0xff]  }
 0x2aa   :  { %2739 = vmatprep.subr.bf16.mxu1 %v4108_v36 }
 0x2ab   :  { %3570 = vmatpush3.bf16.msra.mxu0 %v4031_v49 }
 0x2ac   :  { %3571 = vmatprep.subr.bf16.mxu0 %v4032_v0 }
 0x2ad   :  { %2740 = vmatpush1.bf16.msra.mxu1 %v4106_v37  ;;  %v4089_v37 = vld [vmem:[#allocation10 + $0x218] ss:$12 sps:$4 sm:$0xff]  }
 0x2ae   :  { %2741 = vmatprep.subr.bf16.mxu1 %v4112_v38  ;;  %v4093_v38 = vld [vmem:[#allocation10 + $0x200] ss:$12 sps:$4 sm:$0xff]  }
 0x2af   :  { %3572 = vmatpush3.bf16.msra.mxu0 %v4033_v50 }
 0x2b0   :  { %2686 = vmatprep.subr.bf16.mxu0 %v4036_v52 }
 0x2b1   :  { %2742 = vmatpush1.bf16.msra.mxu1 %v4110_v39  ;;  %v4097_v39 = vld [vmem:[#allocation10 + $0x1e8] ss:$12 sps:$4 sm:$0xff]  }
 0x2b2   :  { %2097 = vmatmul.mubr.bf16.vlgmr.msra.gmra.mxu0 %v4508_v18  ;;  %v4075_v18 = vld [vmem:[#allocation10 + $0xf4] ss:$12 sps:$4 sm:$0xff]   ;;  %3588 = vmatprep.subr.bf16.mxu1 %v4114_v40 }
 0x2b3   :  { %2687 = vmatpush1.bf16.msra.mxu0 %v4034_v51 }
 0x2b4   :  { %2688 = vmatprep.subr.bf16.mxu0 %v4039_v53 }
 0x2b7   :  { %2689 = vmatpush1.bf16.msra.mxu0 %v4037_v54 }
 0x2b8   :  { %2690 = vmatprep.subr.bf16.mxu0 %v4042_v55 }
 0x2bb   :  { %2691 = vmatpush1.bf16.msra.mxu0 %v4040_v56 }
 0x2bc   :  { %2692 = vmatprep.subr.bf16.mxu0 %v4045_v57 }
 0x2bf   :  { %2693 = vmatpush1.bf16.msra.mxu0 %v4043_v58 }
 0x2c0   :  { %2694 = vmatprep.subr.bf16.mxu0 %v4048_v59 }
 0x2c3   :  { %2695 = vmatpush1.bf16.msra.mxu0 %v4046_v60 }
 0x2c4   :  { %2696 = vmatprep.subr.bf16.mxu0 %v4051_v61 }
 0x2c7   :  { %2697 = vmatpush1.bf16.msra.mxu0 %v4049_v62 }
 0x2c8   :  { %2698 = vmatprep.subr.bf16.mxu0 %v4054_v63 }
 0x2cb   :  { %2699 = vmatpush1.bf16.msra.mxu0 %v4052_v2 }
 0x2cc   :  { %2700 = vmatprep.subr.bf16.mxu0 %v4057_v3 }
 0x2cf   :  { %2701 = vmatpush1.bf16.msra.mxu0 %v4055_v4 }
 0x2d0   :  { %2702 = vmatprep.subr.bf16.mxu0 %v4060_v5 }
 0x2d3   :  { %2703 = vmatpush2.bf16.msra.mxu0 %v4058_v7 }
 0x2d4   :  { %2704 = vmatprep.subr.bf16.mxu0 %v4063_v9 }
 0x2d7   :  { %2705 = vmatpush2.bf16.msra.mxu0 %v4061_v10 }
 0x2d8   :  { %2706 = vmatprep.subr.bf16.mxu0 %v4066_v11  ;;  %v1594_v11 = vrot.slane %v1578_v45, %v4484_v13 }
 0x2db   :  { %2707 = vmatpush2.bf16.msra.mxu0 %v4064_v12 }
 0x2dc   :  { %2708 = vmatprep.subr.bf16.mxu0 %v4069_v14 }
 0x2df   :  { %2709 = vmatpush2.bf16.msra.mxu0 %v4067_v15 }
 0x2e0   :  { %2710 = vmatprep.subr.bf16.mxu0 %v4072_v16 }
 0x2e3   :  { %2711 = vmatpush2.bf16.msra.mxu0 %v4070_v17 }
 0x2e4   :  { %2712 = vmatprep.subr.bf16.mxu0 %v4075_v18 }
 0x2e7   :  { %2713 = vmatpush2.bf16.msra.mxu0 %v4073_v19 }
 0x2e8   :  { %2714 = vmatprep.subr.bf16.mxu0 %v4078_v20 }
 0x2eb   :  { %2715 = vmatpush2.bf16.msra.mxu0 %v4076_v21 }
 0x2ec   :  { %2716 = vmatprep.subr.bf16.mxu0 %v4081_v22 }
 0x2ef   :  { %2717 = vmatpush2.bf16.msra.mxu0 %v4079_v23 }
 0x2f0   :  { %3704 = vmatprep.subr.bf16.mxu0 %v4363_v1 }
 0x32f   :  { %v2016_v41 = vpop.f32.mrf.mxu1 }
 0x330   :  { %v2017_v48 = vadd.f32 %v2016_v41, %v1586_v46  ;;  %v4101_v41 = vld [vmem:[#allocation10 + $0x1d0] ss:$12 sps:$4 sm:$0xff]   ;;  %v4113_v46 = vld [vmem:[#allocation10 + $0x188] ss:$12 sps:$4 sm:$0xff]  }
 0x331   :  { %v2018_v42 = vpop.f32.mrf.mxu1 }
 0x332   :  { %v2019_v50 = vadd.f32 %v2018_v42, %v1590_v47 }
 0x333   :  { %v2020_v43 = vpop.f32.mrf.mxu1 }
 0x334   :  { %v4105_v43 = vld [vmem:[#allocation10 + $0x1b8] ss:$12 sps:$4 sm:$0xff]  }
 0x335   :  { %v2021_v44 = vpop.f32.mrf.mxu1 }
 0x336   :  { %v4109_v44 = vld [vmem:[#allocation10 + $0x1a0] ss:$12 sps:$4 sm:$0xff]  }
 0x352   :  { %v2057_v49 = vpop.f32.mrf.mxu0  ;;  %v2138_v0 = vpop.f32.mrf.mxu1 }
 0x353   :  { %v2058_v51 = vadd.f32 %v2057_v49, %v2017_v48 }
 0x354   :  { %v2059_v52 = vpop.f32.mrf.mxu0  ;;  %v3702_v53 = vpop.f32.mrf.mxu1 }
 0x355   :  { %v2144_v54 = vmin.f32 %v2058_v51, 20.0  ;;  %v2060_v55 = vadd.f32 %v2059_v52, %v2019_v50  ;;  %vm2147_vm0 = vcmp.gt.f32.partialorder %v2058_v51, 20.0  ;;  %v4115_v53 = vld [vmem:[#allocation10 + $0xb0] ss:$12 sps:$4 sm:$0xff]  }
 0x356   :  { %v2061_v56 = vpop.f32.mrf.mxu0  ;;  %v2141_v57 = vpop.f32.mrf.mxu1 }
 0x357   :  { %v2150_v58 = vmul.f32 1.442695, %v2144_v54  ;;  %v2145_v59 = vmin.f32 %v2060_v55, 20.0  ;;  %vm2148_vm3 = vcmp.gt.f32.partialorder %v2060_v55, 20.0  ;;  %v4117_v56 = vld [vmem:[#allocation10 + $0x98] ss:$12 sps:$4 sm:$0xff]  }
 0x358   :  { %v2062_v60 = vpop.f32.mrf.mxu0  ;;  %v3703_v61 = vpop.f32.mrf.mxu1  ;;  %v4118_v57 = vld [vmem:[#allocation10 + $0x140] ss:$12 sps:$4 sm:$0xff]  }
 0x359   :  { %4178 = vpow2.f32 %v2150_v58  ;;  %v2152_v62 = vmul.f32 1.442695, %v2145_v59  ;;  %v4119_v58 = vld [vmem:[#allocation10 + $0x80] ss:$12 sps:$4 sm:$0xff]   ;;  %v4120_v59 = vld [vmem:[#allocation10 + $0x128] ss:$12 sps:$4 sm:$0xff]  }
 0x35a   :  { %v4121_v60 = vld [vmem:[#allocation10 + $0x68] ss:$12 sps:$4 sm:$0xff]   ;;  %v4122_v61 = vld [vmem:[#allocation10 + $0x110] ss:$12 sps:$4 sm:$0xff]  }
 0x35b   :  { %4180 = vpow2.f32 %v2152_v62  ;;  %v4123_v62 = vld [vmem:[#allocation10 + $0x50] ss:$12 sps:$4 sm:$0xff]  }
 0x366   :  { %v4179_v63 = vpop.eup %4178 }
 0x367   :  { %v2156_v2 = vadd.f32 1.0, %v4179_v63  ;;  %v2159_v5 = vmul.f32 -0.5, %v4179_v63  ;;  %v2162_v12 = vand.u32 2147483647, %v4179_v63 }
 0x368   :  { %v4181_v3 = vpop.eup %4180 }
 0x369   :  { %4182 = vlog2.f32 %v2156_v2  ;;  %v2165_v4 = vadd.f32 1.0, %v4181_v3  ;;  %v2168_v7 = vmul.f32 -0.5, %v4181_v3  ;;  %v2160_v10 = vadd.f32 1.0, %v2159_v5  ;;  %v4125_v2 = vld [vmem:[#allocation10 + $0x38] ss:$12 sps:$4 sm:$0xff]  }
 0x36a   :  { %v2171_v19 = vand.u32 2147483647, %v4181_v3  ;;  %vm2163_vm15 = vcmp.lt.f32.partialorder %v2162_v12, 0.0004427343  ;;  %v4128_v5 = vld [vmem:[#allocation10 + $0xc8] ss:$12 sps:$4 sm:$0xff]  }
 0x36b   :  { %4184 = vlog2.f32 %v2165_v4  ;;  %v2169_v16 = vadd.f32 1.0, %v2168_v7  ;;  %v2161_v21 = vmul.f32 %v4179_v63, %v2160_v10  ;;  %v4124_v63 = vld [vmem:[#allocation10 + $0xf8] ss:$12 sps:$4 sm:$0xff]   ;;  %v4127_v4 = vld [vmem:[#allocation10 + $0x20] ss:$12 sps:$4 sm:$0xff]   ;;  %v4133_v12 = vld [vmem:[#allocation11 + $0x30] sm:$0xff]  }
 0x36c   :  { %vm2172_vm1 = vcmp.lt.f32.partialorder %v2171_v19, 0.0004427343  ;;  %v4129_v7 = vld [vmem:[#allocation10 + $0x8] ss:$12 sps:$4 sm:$0xff]   ;;  %v4131_v10 = vld [vmem:[#allocation11 + $0x38] sm:$0xff]  }
 0x36d   :  { %v2170_v28 = vmul.f32 %v4181_v3, %v2169_v16  ;;  %v4126_v3 = vld [vmem:[#allocation10 + $0xe0] ss:$12 sps:$4 sm:$0xff]   ;;  %v4139_v19 = vld [vmem:[#allocation11 + $0x18] sm:$0xff]  }
 0x36e   :  { %v4136_v16 = vld [vmem:[#allocation11 + $0x60] sm:$0xff]  }
 0x372   :  { %v3573_v9 = vpop.f32.mrf.mxu0 }
 0x374   :  { %v3574_v14 = vpop.f32.mrf.mxu0 }
 0x375   :  { %v3575_v15 = vadd.f32 %v3574_v14, %v3573_v9  ;;  %v4130_v9 = vld [vmem:[#allocation11 + $0x78] sm:$0xff]   ;;  %v4134_v14 = vld [vmem:[#allocation11 + $0x68] sm:$0xff]  }
 0x376   :  { %v4183_v17 = vpop.eup %4182  ;;  %v3576_v18 = vpop.f32.mrf.mxu0 }
 0x377   :  { %v2158_v20 = vmul.f32 0.6931472, %v4183_v17  ;;  %v2099_v22 = vadd.f32 %v3575_v15, %v1594_v11  ;;  %v4132_v11 = vld [vmem:[#allocation11 + $0x70] sm:$0xff]   ;;  %v4135_v15 = vld [vmem:[#allocation11 + $0x28] sm:$0xff]   ;;  %v4137_v17 = vld [vmem:[#allocation11 + $0x20] sm:$0xff]  }
 0x378   :  { %v4185_v23 = vpop.eup %4184  ;;  %v3577_v24 = vpop.f32.mrf.mxu0  ;;  %v4138_v18 = vld [vmem:[#allocation11 + $0x58] sm:$0xff]  }
 0x379   :  { %v2164_v25 = vsel %vm2163_vm15, %v2161_v21, %v2158_v20  ;;  %v2139_v26 = vadd.f32 %v2138_v0, %v2099_v22  ;;  %v2167_v27 = vmul.f32 0.6931472, %v4185_v23  ;;  %v4140_v20 = vld [vmem:[#allocation11 + $0x50] sm:$0xff]   ;;  %v4142_v22 = vld [vmem:[#allocation11 + $0x48] sm:$0xff]   ;;  %v4144_v24 = vld [vmem:[#allocation11 + $0x40] sm:$0xff]  }
 0x37a   :  { %v2183_v29 = vsel %vm2147_vm0, %v2058_v51, %v2164_v25  ;;  %v4141_v21 = vld [vmem:[#allocation11 + $0x10] sm:$0xff]   ;;  %v4143_v23 = vld [vmem:[#allocation11 + $0x8] sm:$0xff]   ;;  %v4145_v25 = vld [vmem:[#allocation11] sm:$0xff]  }
 0x37b   :  { %v2146_v30 = vmin.f32 %v2139_v26, 20.0  ;;  %v2173_v31 = vsel %vm2172_vm1, %v2170_v28, %v2167_v27  ;;  %v4529_v36 = vpack.c.bf16 %v2183_v29, %v2183_v29  ;;  %vm2149_vm5 = vcmp.gt.f32.partialorder %v2139_v26, 20.0  ;;  %v4147_v27 = vld [vmem:[#allocation11 + $0xb0] sm:$0xff]   ;;  %v4148_v28 = vld [vmem:[#allocation11 + $0xa8] sm:$0xff]   ;;  %v4149_v29 = vld [vmem:[#allocation11 + $0xa0] sm:$0xff]  }
 0x37c   :  { %v2184_v32 = vsel %vm2148_vm3, %v2060_v55, %v2173_v31  ;;  %v4116_v55 = vld [vmem:[#allocation10 + $0x158] ss:$12 sps:$4 sm:$0xff]   ;;  %v4151_v31 = vld [vmem:[#allocation11 + $0x90] sm:$0xff]  }
 0x37d   :  { %v2154_v33 = vmul.f32 1.442695, %v2146_v30  ;;  %v2284_v34 = vpack.c.bf16 %v2184_v32, %v2184_v32  ;;  %v4150_v30 = vld [vmem:[#allocation11 + $0x98] sm:$0xff]   ;;  %v4152_v32 = vld [vmem:[#allocation11 + $0x88] sm:$0xff]  }
 0x37f   :  { %4186 = vpow2.f32 %v2154_v33  ;;  %2718 = vmatprep.mubr.bf16.mxu0 %v2284_v34  ;;  %v4153_v33 = vld [vmem:[#allocation11 + $0x80] sm:$0xff]  }
 0x380   :  { %2719 = vmatmul.mubr.bf16.vlgmr.msra.gmra.mxu0 %v4529_v36 }
 0x381   :  { %3705 = vmatpush3.bf16.msra.mxu0 %v4085_v35  ;;  %3720 = vmatprep.mubr.msk.bf16.mxu0 %vm4364_vm2, %v4363_v1 }
 0x382   :  { %3706 = vmatprep.subr.bf16.mxu0 %v4363_v1 }
 0x385   :  { %3707 = vmatpush3.bf16.msra.mxu0 %v4089_v37 }
 0x386   :  { %3708 = vmatprep.subr.bf16.mxu0 %v4363_v1 }
 0x389   :  { %3709 = vmatpush3.bf16.msra.mxu0 %v4093_v38  ;;  %v2282_v38 = vld [vmem:[%s4572_s8] sm:$0x7] }
 0x38a   :  { %3710 = vmatprep.subr.bf16.mxu0 %v4363_v1 }
 0x38c   :  { %v4187_v40 = vpop.eup %4186 }
 0x38d   :  { %3711 = vmatpush3.bf16.msra.mxu0 %v4097_v39  ;;  %v2174_v42 = vadd.f32 1.0, %v4187_v40  ;;  %v2177_v45 = vmul.f32 -0.5, %v4187_v40  ;;  %v2180_v48 = vand.u32 2147483647, %v4187_v40  ;;  %v2290_v39 = vrot.slane %v2282_v38, %v4475_v6 }
 0x38e   :  { %3712 = vmatprep.subr.bf16.mxu0 %v4363_v1 }
 0x38f   :  { %4188 = vlog2.f32 %v2174_v42  ;;  %v2178_v47 = vadd.f32 1.0, %v2177_v45  ;;  %vm2181_vm4 = vcmp.lt.f32.partialorder %v2180_v48, 0.0004427343 }
 0x391   :  { %3713 = vmatpush3.bf16.msra.mxu0 %v4101_v41  ;;  %v2179_v50 = vmul.f32 %v4187_v40, %v2178_v47  ;;  %v2294_v40 = vrot.slane %v2282_v38, %v4477_v8 }
 0x392   :  { %3714 = vmatprep.subr.bf16.mxu0 %v4363_v1 }
 0x395   :  { %3715 = vmatpush3.bf16.msra.mxu0 %v4105_v43 }
 0x396   :  { %3716 = vmatprep.subr.bf16.mxu0 %v4363_v1 }
 0x399   :  { %3717 = vmatpush3.bf16.msra.mxu0 %v4109_v44 }
 0x39a   :  { %3718 = vmatprep.subr.bf16.mxu0 %v4363_v1 }
 0x39c   :  { %v4189_v49 = vpop.eup %4188 }
 0x39d   :  { %3719 = vmatpush3.bf16.msra.mxu0 %v4113_v46  ;;  %v2176_v0 = vmul.f32 0.6931472, %v4189_v49 }
 0x39e   :  { %3724 = vmatprep.subr.bf16.mxu0 %v4363_v1 }
 0x39f   :  { %v2182_v51 = vsel %vm2181_vm4, %v2179_v50, %v2176_v0 }
 0x3a0   :  { %v2185_v52 = vsel %vm2149_vm5, %v2139_v26, %v2182_v51  ;;  %v4146_v26 = vld [vmem:[#allocation11 + $0xb8] sm:$0xff]  }
 0x3a1   :  { %v2285_v54 = vpack.c.bf16 %v2185_v52, %v2185_v52 }
 0x3a3   :  { %2760 = vmatmul.mubr.bf16.vlgmr.msra.gmra.mxu1 %v2285_v54  ;;  %3721 = vmatmul.mubr.bf16.vlgmr.msra.gmra.mxu0 %v2285_v54 }
 0x3a4   :  { %3589 = vmatpush3.bf16.msra.mxu1 %v4115_v53  ;;  %2800 = vmatprep.mubr.bf16.mxu1 %v2284_v34 }
 0x3a5   :  { %3590 = vmatprep.subr.bf16.mxu1 %v4116_v55  ;;  %3740 = vmatprep.mubr.msk.bf16.mxu0 %vm4364_vm2, %v4363_v1 }
 0x3a6   :  { %3725 = vmatpush3.bf16.msra.mxu0 %v4146_v26 }
 0x3a7   :  { %3726 = vmatprep.subr.bf16.mxu0 %v4363_v1 }
 0x3a8   :  { %3591 = vmatpush3.bf16.msra.mxu1 %v4117_v56 }
 0x3a9   :  { %3592 = vmatprep.subr.bf16.mxu1 %v4118_v57 }
 0x3aa   :  { %3727 = vmatpush3.bf16.msra.mxu0 %v4147_v27 }
 0x3ab   :  { %3728 = vmatprep.subr.bf16.mxu0 %v4363_v1 }
 0x3ac   :  { %3593 = vmatpush3.bf16.msra.mxu1 %v4119_v58 }
 0x3ad   :  { %3594 = vmatprep.subr.bf16.mxu1 %v4120_v59 }
 0x3ae   :  { %3729 = vmatpush3.bf16.msra.mxu0 %v4148_v28 }
 0x3af   :  { %3730 = vmatprep.subr.bf16.mxu0 %v4363_v1 }
 0x3b0   :  { %3595 = vmatpush3.bf16.msra.mxu1 %v4121_v60 }
 0x3b1   :  { %3596 = vmatprep.subr.bf16.mxu1 %v4122_v61  ;;  %v2298_v61 = vrot.slane %v2282_v38, %v4484_v13 }
 0x3b2   :  { %3731 = vmatpush3.bf16.msra.mxu0 %v4149_v29 }
 0x3b3   :  { %3732 = vmatprep.subr.bf16.mxu0 %v4363_v1 }
 0x3b4   :  { %3597 = vmatpush3.bf16.msra.mxu1 %v4123_v62 }
 0x3b5   :  { %3598 = vmatprep.subr.bf16.mxu1 %v4124_v63 }
 0x3b6   :  { %3733 = vmatpush3.bf16.msra.mxu0 %v4150_v30 }
 0x3b7   :  { %3734 = vmatprep.subr.bf16.mxu0 %v4363_v1 }
 0x3b8   :  { %3599 = vmatpush3.bf16.msra.mxu1 %v4125_v2 }
 0x3b9   :  { %3600 = vmatprep.subr.bf16.mxu1 %v4126_v3 }
 0x3ba   :  { %3735 = vmatpush3.bf16.msra.mxu0 %v4151_v31 }
 0x3bb   :  { %3736 = vmatprep.subr.bf16.mxu0 %v4363_v1 }
 0x3bc   :  { %3601 = vmatpush3.bf16.msra.mxu1 %v4127_v4 }
 0x3bd   :  { %3602 = vmatprep.subr.bf16.mxu1 %v4128_v5 }
 0x3be   :  { %3737 = vmatpush3.bf16.msra.mxu0 %v4152_v32 }
 0x3bf   :  { %3738 = vmatprep.subr.bf16.mxu0 %v4363_v1 }
 0x3c0   :  { %3603 = vmatpush3.bf16.msra.mxu1 %v4129_v7 }
 0x3c1   :  { %3619 = vmatprep.subr.bf16.mxu1 %v4130_v9 }
 0x3c2   :  { %3739 = vmatpush3.bf16.msra.mxu0 %v4153_v33 }
 0x3c3   :  { %2801 = vmatmul.mubr.bf16.vlgmr.msra.gmra.mxu1 %v4529_v36 }
 0x3c4   :  { %3620 = vmatpush3.bf16.msra.mxu1 %v4131_v10 }
 0x3c5   :  { %3621 = vmatprep.subr.bf16.mxu1 %v4132_v11 }
 0x3c8   :  { %3622 = vmatpush3.bf16.msra.mxu1 %v4133_v12 }
 0x3c9   :  { %3623 = vmatprep.subr.bf16.mxu1 %v4134_v14 }
 0x3cc   :  { %3624 = vmatpush3.bf16.msra.mxu1 %v4135_v15 }
 0x3cd   :  { %3625 = vmatprep.subr.bf16.mxu1 %v4136_v16 }
 0x3d0   :  { %3626 = vmatpush3.bf16.msra.mxu1 %v4137_v17 }
 0x3d1   :  { %3627 = vmatprep.subr.bf16.mxu1 %v4138_v18 }
 0x3d4   :  { %3628 = vmatpush3.bf16.msra.mxu1 %v4139_v19 }
 0x3d5   :  { %3629 = vmatprep.subr.bf16.mxu1 %v4140_v20 }
 0x3d8   :  { %3630 = vmatpush3.bf16.msra.mxu1 %v4141_v21 }
 0x3d9   :  { %3631 = vmatprep.subr.bf16.mxu1 %v4142_v22 }
 0x3dc   :  { %3632 = vmatpush3.bf16.msra.mxu1 %v4143_v23 }
 0x3dd   :  { %3633 = vmatprep.subr.bf16.mxu1 %v4144_v24 }
 0x3e0   :  { %3634 = vmatpush3.bf16.msra.mxu1 %v4145_v25 }
 0x440   :  { %v2720_v34 = vpop.f32.mrf.mxu0 }
 0x441   :  { %v2721_v41 = vadd.f32 %v2720_v34, %v2290_v39 }
 0x442   :  { %v2722_v35 = vpop.f32.mrf.mxu0 }
 0x443   :  { %v2723_v44 = vadd.f32 %v2722_v35, %v2294_v40 }
 0x444   :  { %v2724_v36 = vpop.f32.mrf.mxu0 }
 0x446   :  { %v2725_v37 = vpop.f32.mrf.mxu0 }
 0x463   :  { %v2761_v42 = vpop.f32.mrf.mxu1  ;;  %v2842_v43 = vpop.f32.mrf.mxu0 }
 0x464   :  { %v2762_v45 = vadd.f32 %v2761_v42, %v2721_v41  ;;  %v3473_v41 = vld [vmem:[%s4574_s10] ss:$0 sm:$0xff] }
 0x465   :  { %v2763_v46 = vpop.f32.mrf.mxu1  ;;  %v3722_v1 = vpop.f32.mrf.mxu0 }
 0x466   :  { %v2848_v47 = vmin.f32 %v2762_v45, 20.0  ;;  %v2764_v48 = vadd.f32 %v2763_v46, %v2723_v44  ;;  %vm2851_vm6 = vcmp.gt.f32.partialorder %v2762_v45, 20.0 }
 0x467   :  { %v2765_v49 = vpop.f32.mrf.mxu1  ;;  %v2845_v0 = vpop.f32.mrf.mxu0 }
 0x468   :  { %v2854_v50 = vmul.f32 1.442695, %v2848_v47  ;;  %v2849_v51 = vmin.f32 %v2764_v48, 20.0  ;;  %vm2852_vm8 = vcmp.gt.f32.partialorder %v2764_v48, 20.0 }
 0x469   :  { %v2766_v52 = vpop.f32.mrf.mxu1  ;;  %v3723_v53 = vpop.f32.mrf.mxu0 }
 0x46a   :  { %4190 = vpow2.f32 %v2854_v50  ;;  %v2856_v54 = vmul.f32 1.442695, %v2849_v51 }
 0x46c   :  { %4192 = vpow2.f32 %v2856_v54 }
 0x477   :  { %v4191_v6 = vpop.eup %4190 }
 0x478   :  { %v2860_v8 = vadd.f32 1.0, %v4191_v6  ;;  %v2863_v57 = vmul.f32 -0.5, %v4191_v6  ;;  %v2866_v62 = vand.u32 2147483647, %v4191_v6 }
 0x479   :  { %v4193_v55 = vpop.eup %4192 }
 0x47a   :  { %4194 = vlog2.f32 %v2860_v8  ;;  %v2869_v56 = vadd.f32 1.0, %v4193_v55  ;;  %v2872_v58 = vmul.f32 -0.5, %v4193_v55  ;;  %v2864_v60 = vadd.f32 1.0, %v2863_v57 }
 0x47b   :  { %v2875_v7 = vand.u32 2147483647, %v4193_v55  ;;  %vm2867_vm2 = vcmp.lt.f32.partialorder %v2866_v62, 0.0004427343 }
 0x47c   :  { %4196 = vlog2.f32 %v2869_v56  ;;  %v2873_v3 = vadd.f32 1.0, %v2872_v58  ;;  %v2865_v10 = vmul.f32 %v4191_v6, %v2864_v60 }
 0x47d   :  { %vm2876_vm7 = vcmp.lt.f32.partialorder %v2875_v7, 0.0004427343 }
 0x47e   :  { %v2874_v18 = vmul.f32 %v4193_v55, %v2873_v3 }
 0x483   :  { %v3604_v59 = vpop.f32.mrf.mxu1 }
 0x485   :  { %v3605_v63 = vpop.f32.mrf.mxu1 }
 0x486   :  { %v3606_v2 = vadd.f32 %v3605_v63, %v3604_v59 }
 0x487   :  { %v4195_v4 = vpop.eup %4194  ;;  %v3607_v5 = vpop.f32.mrf.mxu1 }
 0x488   :  { %v2862_v9 = vmul.f32 0.6931472, %v4195_v4  ;;  %v2803_v11 = vadd.f32 %v3606_v2, %v2298_v61 }
 0x489   :  { %v4197_v12 = vpop.eup %4196  ;;  %v3608_v14 = vpop.f32.mrf.mxu1 }
 0x48a   :  { %v2868_v15 = vsel %vm2867_vm2, %v2865_v10, %v2862_v9  ;;  %v2843_v16 = vadd.f32 %v2842_v43, %v2803_v11  ;;  %v2871_v17 = vmul.f32 0.6931472, %v4197_v12 }
 0x48b   :  { %v2887_v13 = vsel %vm2851_vm6, %v2762_v45, %v2868_v15 }
 0x48c   :  { %v2850_v19 = vmin.f32 %v2843_v16, 20.0  ;;  %v2877_v20 = vsel %vm2876_vm7, %v2874_v18, %v2871_v17  ;;  %v2939_v24 = vpack.c.bf16 %v2887_v13, %v2887_v13  ;;  %vm2853_vm10 = vcmp.gt.f32.partialorder %v2843_v16, 20.0 }
 0x48d   :  { %v2888_v21 = vsel %vm2852_vm8, %v2764_v48, %v2877_v20 }
 0x48e   :  { %v2858_v22 = vmul.f32 1.442695, %v2850_v19  ;;  %v2940_v23 = vpack.c.bf16 %v2888_v21, %v2888_v21 }
 0x490   :  { %4198 = vpow2.f32 %v2858_v22  ;;  %3124 = vmatprep.mubr.bf16.mxu1 %v2940_v23 }
 0x491   :  { %3125 = vmatmul.mubr.bf16.vlgmr.msra.gmra.mxu1 %v2939_v24 }
 0x49d   :  { %v4199_v25 = vpop.eup %4198 }
 0x49e   :  { %v2878_v26 = vadd.f32 1.0, %v4199_v25  ;;  %v2881_v27 = vmul.f32 -0.5, %v4199_v25  ;;  %v2884_v29 = vand.u32 2147483647, %v4199_v25 }
 0x4a0   :  { %4200 = vlog2.f32 %v2878_v26  ;;  %v2882_v28 = vadd.f32 1.0, %v2881_v27  ;;  %vm2885_vm9 = vcmp.lt.f32.partialorder %v2884_v29, 0.0004427343 }
 0x4a2   :  { %v2883_v32 = vmul.f32 %v4199_v25, %v2882_v28 }
 0x4ad   :  { %v4201_v30 = vpop.eup %4200 }
 0x4ae   :  { %v2880_v31 = vmul.f32 0.6931472, %v4201_v30 }
 0x4b0   :  { %v2886_v33 = vsel %vm2885_vm9, %v2883_v32, %v2880_v31 }
 0x4b1   :  { %v2889_v34 = vsel %vm2853_vm10, %v2843_v16, %v2886_v33 }
 0x4b2   :  { %v2941_v35 = vpack.c.bf16 %v2889_v34, %v2889_v34 }
 0x4b4   :  { %3741 = vmatmul.mubr.bf16.vlgmr.msra.gmra.mxu0 %v2941_v35 }
 0x551   :  { %v3635_v36 = vpop.f32.mrf.mxu1 }
 0x553   :  { %v3636_v37 = vpop.f32.mrf.mxu1 }
 0x554   :  { %v3637_v40 = vadd.f32 %v3636_v37, %v3635_v36 }
 0x555   :  { %v3638_v38 = vpop.f32.mrf.mxu1 }
 0x556   :  { %v3127_v42 = vadd.f32 %v3637_v40, %v3473_v41 }
 0x557   :  { %v3639_v39 = vpop.f32.mrf.mxu1 }
 0x574   :  { %v3166_v43 = vpop.f32.mrf.mxu0 }
 0x575   :  { %v3167_v44 = vadd.f32 %v3166_v43, %v3127_v42 }
 0x576   :  { %v3742_v45 = vpop.f32.mrf.mxu0 }
 0x577   :  { %3172 = vst [vmem:[#allocation13] sm:$0xff] %v3167_v44 }
 0x578   :  { %v3169_v46 = vpop.f32.mrf.mxu0 }
 0x579   :  { %4333 = shalt.err (!%p4330_p6)
}
 0x57a   :  { %3182 = dma.vmem_to_hbm [thread:$0]  %s3180_s13, 128, %s4575_s11, [#allocation4]   ;;  %v3743_v1 = vpop.f32.mrf.mxu0 }
 0x57b   :  { %4350 = dma.done.wait [#allocation4], 128  }
 0x57c   :  { %4351 = vsyncadd [#allocation4], 4294967168 }
 0x57d   :  { %3186 = vsyncpa [#allocation3], 1 }
 0x57e   :  { %3187 = vsyncpa [#allocation6], 1 }
 0x57f   :  { %3188 = vsyncpa [#allocation9], 1 }
 0x580   :  { %3189 = vsyncpa [#allocation12], 1 }
 0x581   :  { %3190 = vsyncpa [#allocation4], 1 }

</bundles_post_ra>
